<compile_context>
chip_gen: v5e
topology: v5e:2x2
jax: 0.10.0
libtpu: 0.0.40
codegen_flags: <defaults>
</compile_context>

<pallas_src>
import jax
import jax.numpy as jnp
from jax import lax
from jax.experimental import pallas as pl
from jax.experimental.pallas import tpu as pltpu


# ---------------------------------------------------------------------------
# Pallas kernel
# ---------------------------------------------------------------------------
def han_seq_kernel(
    x_ref,        # (T, TB, 2E) bf16  [x(t) | x(T-1-t)] pairs, time-major
    wih_ref,      # (2E, 6H)    bf16  fused fwd/bwd input projection (block-diag)
    gib_ref,      # (1, 6H)     f32   folded b_ih (+ b_hh for r,z gates)
    whh_ref,      # (2H, 6H)    bf16  block_diag(whh_f, whh_b), gate-interleaved
    bhhn_ref,     # (1, 2H)     f32   [b_hn_f | b_hn_b] (scaled by r inside cell)
    wattf_ref,    # (H, A)      bf16
    wattb_ref,    # (H, A)      bf16
    batt_ref,     # (1, A)      f32
    uatt_ref,     # (1, A)      f32   attention context vector as a row
    out_ref,      # (TB, 2H)    f32
    rnn_f_scr,    # VMEM (T, TB, H) f32
    rnn_b_scr,    # VMEM (T, TB, H) f32
):
    T, B, E2 = x_ref.shape
    H = wattf_ref.shape[0]
    A = wattf_ref.shape[1]
    H2, H4, G = 2 * H, 4 * H, 6 * H

    # Hoisted fused input projection: ONE (T*B, 2E) @ (2E, 6H) matmul covers both
    # directions and all timesteps; b_ih and the r/z-gate b_hh are folded in.
    gi_all = (
        jnp.dot(x_ref[...].reshape(T * B, E2), wih_ref[...],
                preferred_element_type=jnp.float32)
        + gib_ref[...]
    ).reshape(T, B, G)

    whh = whh_ref[...]
    # Hoisted broadcast (JAX does not CSE broadcast_in_dim inside loops).
    bhh_n = jnp.broadcast_to(bhhn_ref[...], (B, H2))

    h = jnp.zeros((B, H2), jnp.float32)   # packed state [h_fwd | h_bwd]

    # Fully-unrolled recurrence (T is compile-time small). Fwd consumes time i,
    # bwd consumes time T-1-i; both share ONE block-diagonal hidden matmul and
    # one fused gate pass per step (gate layout [r_f r_b | z_f z_b | n_f n_b]).
    # TODO(synk): for large T switch to lax.fori_loop(..., unroll=4) with gi kept
    # in a VMEM scratch to bound live ranges / vreg pressure.
    for i in range(T):
        gi = gi_all[i]                                            # (B, 6H)
        gh = jnp.dot(h.astype(jnp.bfloat16), whh,
                     preferred_element_type=jnp.float32)          # (B, 6H)
        rz = jax.nn.sigmoid(gi[:, :H4] + gh[:, :H4])              # (B, 4H)
        r = rz[:, :H2]                                            # [r_f | r_b]
        z = rz[:, H2:]                                            # [z_f | z_b]
        n = jnp.tanh(gi[:, H4:] + r * (gh[:, H4:] + bhh_n))       # [n_f | n_b]
        h = (1.0 - z) * n + z * h
        # Full-row stores into per-direction scratches (no lane-offset masked
        # stores on the serial chain); the bwd half is stored time-aligned.
        rnn_f_scr[i] = h[:, :H]
        rnn_b_scr[T - 1 - i] = h[:, H:]

    # ---- HAN attention epilogue: u = tanh(W h + b); score = u . ctx; softmax ----
    rf = rnn_f_scr[...]                                           # (T, B, H)
    rb = rnn_b_scr[...]                                           # (T, B, H)
    uf = jnp.dot(rf.reshape(T * B, H).astype(jnp.bfloat16), wattf_ref[...],
                 preferred_element_type=jnp.float32)
    ub = jnp.dot(rb.reshape(T * B, H).astype(jnp.bfloat16), wattb_ref[...],
                 preferred_element_type=jnp.float32)
    u = jnp.tanh((uf + ub).reshape(T, B, A) + batt_ref[...])      # (T, B, A)

    # N=1 matmul replaced by VPU multiply + lane reduction.
    scores = jnp.sum(u * uatt_ref[...], axis=-1, keepdims=True)   # (T, B, 1)
    m = jnp.max(scores, axis=0, keepdims=True)
    e = jnp.exp(scores - m)
    alpha = e / jnp.sum(e, axis=0, keepdims=True)   # exact divide (epilogue only)

    # Weighted sum over time; output halves assembled once.
    out_ref[:, :H] = jnp.sum(alpha * rf, axis=0)
    out_ref[:, H:] = jnp.sum(alpha * rb, axis=0)


# ---------------------------------------------------------------------------
# Wrapper
# ---------------------------------------------------------------------------
def _fuse_gate_blocks(w_f, w_b, H):
    """Block-diagonal fwd/bwd fusion with gate columns interleaved as
    [r_f r_b | z_f z_b | n_f n_b]; fwd rows on top, bwd rows on the bottom."""
    zf = jnp.zeros_like(w_f[:, :H])
    zb = jnp.zeros_like(w_b[:, :H])
    top = jnp.concatenate(
        [w_f[:, :H], zf, w_f[:, H:2 * H], zf, w_f[:, 2 * H:], zf], axis=1)
    bot = jnp.concatenate(
        [zb, w_b[:, :H], zb, w_b[:, H:2 * H], zb, w_b[:, 2 * H:]], axis=1)
    return jnp.concatenate([top, bot], axis=0)


def han_sequentitial_pallas(x_tbe, params, batch_tile=8):
    """x_tbe: (T, B, E) float32 embedded input (time-major)."""
    T, B, E = x_tbe.shape
    H = params["whh_f"].shape[0]
    H2 = 2 * H
    A = params["watt"].shape[1]

    # Pad batch to a sublane-aligned tile (for production shapes use a larger
    # batch_tile and mind the v7x 64 MiB VMEM / per-call overhead).
    TB = batch_tile
    Bp = ((B + TB - 1) // TB) * TB
    if Bp != B:
        x_tbe = jnp.pad(x_tbe, ((0, 0), (0, Bp - B), (0, 0)))

    # Pair each step's fwd input with the bwd direction's (time-reversed) input so
    # one fused matmul row feeds both directions of a recurrence step.
    x_pair = jnp.concatenate([x_tbe, x_tbe[::-1]], axis=-1).astype(jnp.bfloat16)

    wih_blk = _fuse_gate_blocks(params["wih_f"], params["wih_b"], H).astype(jnp.bfloat16)
    whh_blk = _fuse_gate_blocks(params["whh_f"], params["whh_b"], H).astype(jnp.bfloat16)

    bih_f, bih_b = params["bih_f"], params["bih_b"]
    bhh_f, bhh_b = params["bhh_f"], params["bhh_b"]
    # Folded biases in the interleaved gate layout; n-gate keeps only b_ih
    # (its b_hh is scaled by r inside the cell, per PyTorch GRU semantics).
    gi_bias = jnp.concatenate([
        bih_f[:, :H] + bhh_f[:, :H],        # r_f
        bih_b[:, :H] + bhh_b[:, :H],        # r_b
        bih_f[:, H:H2] + bhh_f[:, H:H2],    # z_f
        bih_b[:, H:H2] + bhh_b[:, H:H2],    # z_b
        bih_f[:, H2:],                      # n_f
        bih_b[:, H2:],                      # n_b
    ], axis=1)
    bhh_n = jnp.concatenate([bhh_f[:, H2:], bhh_b[:, H2:]], axis=1)   # (1, 2H)

    watt_f = params["watt"][:H].astype(jnp.bfloat16)
    watt_b = params["watt"][H:].astype(jnp.bfloat16)
    uatt_row = params["uatt"].reshape(1, A)

    def full2d(a):
        return pl.BlockSpec(a.shape, lambda b: (0, 0))

    out = pl.pallas_call(
        han_seq_kernel,
        out_shape=jax.ShapeDtypeStruct((Bp, H2), jnp.float32),
        grid=(Bp // TB,),
        in_specs=[
            pl.BlockSpec((T, TB, 2 * E), lambda b: (0, b, 0)),
            full2d(wih_blk), full2d(gi_bias), full2d(whh_blk), full2d(bhh_n),
            full2d(watt_f), full2d(watt_b), full2d(params["batt"]), full2d(uatt_row),
        ],
        out_specs=pl.BlockSpec((TB, H2), lambda b: (b, 0)),
        scratch_shapes=[
            pltpu.VMEM((T, TB, H), jnp.float32),
            pltpu.VMEM((T, TB, H), jnp.float32),
        ],
        compiler_params=pltpu.CompilerParams(
            dimension_semantics=("parallel",),
        ),
    )(x_pair, wih_blk, gi_bias, whh_blk, bhh_n,
      watt_f, watt_b, params["batt"], uatt_row)
    return out[:B]


# ---------------------------------------------------------------------------
# Pure-JAX f32 reference (same math as the PyTorch module) for verification
# ---------------------------------------------------------------------------
def _gru_dir_ref(x, wih, whh, bih, bhh, reverse):
    H = whh.shape[0]

    def step(h, x_t):
        gi = x_t @ wih + bih
        gh = h @ whh + bhh
        r = jax.nn.sigmoid(gi[:, :H] + gh[:, :H])
        z = jax.nn.sigmoid(gi[:, H:2 * H] + gh[:, H:2 * H])
        n = jnp.tanh(gi[:, 2 * H:] + r * gh[:, 2 * H:])
        h_new = (1.0 - z) * n + z * h
        return h_new, h_new

    h0 = jnp.zeros((x.shape[1], H), jnp.float32)
    xs = x[::-1] if reverse else x
    _, hs = lax.scan(step, h0, xs)
    return hs[::-1] if reverse else hs


def han_sequentitial_ref(x_tbe, params):
    hf = _gru_dir_ref(x_tbe, params["wih_f"], params["whh_f"],
                      params["bih_f"], params["bhh_f"], reverse=False)
    hb = _gru_dir_ref(x_tbe, params["wih_b"], params["whh_b"],
                      params["bih_b"], params["bhh_b"], reverse=True)
    rnn_out = jnp.concatenate([hf, hb], axis=-1)              # (T, B, 2H)
    u = jnp.tanh(rnn_out @ params["watt"] + params["batt"])   # (T, B, A)
    scores = (u @ params["uatt"])[..., 0]                     # (T, B)
    alpha = jax.nn.softmax(scores, axis=0)
    return jnp.sum(alpha[:, :, None] * rnn_out, axis=0)       # (B, 2H)


# ---------------------------------------------------------------------------
# Main
# ---------------------------------------------------------------------------
if __name__ == "__main__":
    B, T = 2, 8          # batch, sequence length
    VOCAB, E = 32, 16    # vocab size, embedding dim
    H = 16               # GRU hidden per direction -> rnn_out dim = 2H = 32
    A = 2 * H            # attention projection dim

    key = jax.random.PRNGKey(0)
    keys = jax.random.split(key, 16)

    def init(k, shape, scale=0.1):
        return (scale * jax.random.normal(k, shape)).astype(jnp.float32)

    emb_table = init(keys[0], (VOCAB, E), 1.0)

    params = {
        # forward GRU (weights stored pre-transposed: x @ W_ih^T == x @ wih)
        "wih_f": init(keys[1], (E, 3 * H)),
        "whh_f": init(keys[2], (H, 3 * H)),
        "bih_f": init(keys[3], (1, 3 * H)),
        "bhh_f": init(keys[4], (1, 3 * H)),
        # backward GRU
        "wih_b": init(keys[5], (E, 3 * H)),
        "whh_b": init(keys[6], (H, 3 * H)),
        "bih_b": init(keys[7], (1, 3 * H)),
        "bhh_b": init(keys[8], (1, 3 * H)),
        # HAN attention
        "watt": init(keys[9], (2 * H, A)),
        "batt": init(keys[10], (1, A)),
        "uatt": init(keys[11], (A, 1)),
    }

    # Token ids (the actual module input); embedding gather stays in plain JAX.
    tokens = jax.random.randint(keys[12], (B, T), 0, VOCAB, dtype=jnp.int32)
    x_bte = emb_table[tokens]                   # (B, T, E)
    x_tbe = jnp.transpose(x_bte, (1, 0, 2))     # (T, B, E)

    out = jax.block_until_ready(han_sequentitial_pallas(x_tbe, params))
    ref = jax.block_until_ready(han_sequentitial_ref(x_tbe, params))

    assert out.shape == (B, 2 * H)
    # Kernel runs matmuls with bf16 weights/activations (f32 accumulation, f32
    # state/gate math) while the reference is full f32, so tolerance covers the
    # bf16 rounding drift over the T-step recurrence; structural bugs are O(1e-1).
    assert jnp.allclose(out, ref, atol=2e-2, rtol=2e-2), (
        f"max abs err = {jnp.max(jnp.abs(out - ref))}")

    print("KERNEL_OK")
</pallas_src>

<mosaic_0001>
module attributes {stable_mosaic.version = 11 : i64} {
  func.func @han_seq_kernel(%arg0: i32, %arg1: memref<8x8x32xbf16, #tpu.memory_space<vmem>>, %arg2: memref<32x96xbf16, #tpu.memory_space<vmem>>, %arg3: memref<1x96xf32, #tpu.memory_space<vmem>>, %arg4: memref<32x96xbf16, #tpu.memory_space<vmem>>, %arg5: memref<1x32xf32, #tpu.memory_space<vmem>>, %arg6: memref<16x32xbf16, #tpu.memory_space<vmem>>, %arg7: memref<16x32xbf16, #tpu.memory_space<vmem>>, %arg8: memref<1x32xf32, #tpu.memory_space<vmem>>, %arg9: memref<1x32xf32, #tpu.memory_space<vmem>>, %arg10: memref<8x32xf32, #tpu.memory_space<vmem>>, %arg11: memref<8x8x16xf32, #tpu.memory_space<vmem>>, %arg12: memref<8x8x16xf32, #tpu.memory_space<vmem>>) attributes {dimension_semantics = [#tpu.dimension_semantics<parallel>], iteration_bounds = array<i64: 1>, scalar_prefetch = 0 : i64, scratch_operands = 2 : i64, tpu.core_type = #tpu.core_type<tc>, window_params = [{transform_indices = @transform_0, window_bounds = array<i64: 8, 8, 32>}, {pipeline_mode = #tpu.pipeline_mode<synchronous>, transform_indices = @transform_1, window_bounds = array<i64: 32, 96>}, {pipeline_mode = #tpu.pipeline_mode<synchronous>, transform_indices = @transform_2, window_bounds = array<i64: 1, 96>}, {pipeline_mode = #tpu.pipeline_mode<synchronous>, transform_indices = @transform_3, window_bounds = array<i64: 32, 96>}, {pipeline_mode = #tpu.pipeline_mode<synchronous>, transform_indices = @transform_4, window_bounds = array<i64: 1, 32>}, {pipeline_mode = #tpu.pipeline_mode<synchronous>, transform_indices = @transform_5, window_bounds = array<i64: 16, 32>}, {pipeline_mode = #tpu.pipeline_mode<synchronous>, transform_indices = @transform_6, window_bounds = array<i64: 16, 32>}, {pipeline_mode = #tpu.pipeline_mode<synchronous>, transform_indices = @transform_7, window_bounds = array<i64: 1, 32>}, {pipeline_mode = #tpu.pipeline_mode<synchronous>, transform_indices = @transform_8, window_bounds = array<i64: 1, 32>}, {transform_indices = @transform_9, window_bounds = array<i64: 8, 32>}]} {
    %c0 = arith.constant 0 : index
    %c0_0 = arith.constant 0 : index
    %c0_1 = arith.constant 0 : index
    %0 = vector.load %arg1[%c0, %c0_0, %c0_1] : memref<8x8x32xbf16, #tpu.memory_space<vmem>>, vector<8x8x32xbf16>
    %1 = vector.shape_cast %0 : vector<8x8x32xbf16> to vector<64x32xbf16>
    %c0_2 = arith.constant 0 : index
    %c0_3 = arith.constant 0 : index
    %2 = vector.load %arg2[%c0_2, %c0_3] : memref<32x96xbf16, #tpu.memory_space<vmem>>, vector<32x96xbf16>
    %cst = arith.constant dense<0.000000e+00> : vector<64x96xf32>
    %3 = tpu.matmul %1, %2, %cst {dimension_numbers = #tpu.dot_dimension_numbers<[1], [0], [0], [1], [0, 0, 1, 1], [], []>} : vector<64x32xbf16>, vector<32x96xbf16>, vector<64x96xf32> -> vector<64x96xf32>
    %c0_4 = arith.constant 0 : index
    %c0_5 = arith.constant 0 : index
    %4 = vector.load %arg3[%c0_4, %c0_5] : memref<1x96xf32, #tpu.memory_space<vmem>>, vector<1x96xf32>
    %5 = vector.broadcast %4 : vector<1x96xf32> to vector<64x96xf32>
    %6 = arith.addf %3, %5 : vector<64x96xf32>
    %7 = vector.shape_cast %6 : vector<64x96xf32> to vector<8x8x96xf32>
    %c0_6 = arith.constant 0 : index
    %c0_7 = arith.constant 0 : index
    %8 = vector.load %arg4[%c0_6, %c0_7] : memref<32x96xbf16, #tpu.memory_space<vmem>>, vector<32x96xbf16>
    %c0_8 = arith.constant 0 : index
    %c0_9 = arith.constant 0 : index
    %9 = vector.load %arg5[%c0_8, %c0_9] : memref<1x32xf32, #tpu.memory_space<vmem>>, vector<1x32xf32>
    %10 = vector.shape_cast %9 : vector<1x32xf32> to vector<1x32xf32>
    %11 = vector.broadcast %10 : vector<1x32xf32> to vector<8x32xf32>
    %cst_10 = arith.constant 0.000000e+00 : f32
    %12 = vector.broadcast %cst_10 : f32 to vector<8x32xf32>
    %13 = vector.extract_strided_slice %7 {offsets = [0, 0, 0], sizes = [1, 8, 96], strides = [1, 1, 1]} : vector<8x8x96xf32> to vector<1x8x96xf32>
    %14 = vector.shape_cast %13 : vector<1x8x96xf32> to vector<8x96xf32>
    %15 = arith.truncf %12 : vector<8x32xf32> to vector<8x32xbf16>
    %cst_11 = arith.constant dense<0.000000e+00> : vector<8x96xf32>
    %16 = tpu.matmul %15, %8, %cst_11 {dimension_numbers = #tpu.dot_dimension_numbers<[1], [0], [0], [1], [0, 0, 1, 1], [], []>} : vector<8x32xbf16>, vector<32x96xbf16>, vector<8x96xf32> -> vector<8x96xf32>
    %17 = vector.extract_strided_slice %14 {offsets = [0, 0], sizes = [8, 64], strides = [1, 1]} : vector<8x96xf32> to vector<8x64xf32>
    %18 = vector.extract_strided_slice %16 {offsets = [0, 0], sizes = [8, 64], strides = [1, 1]} : vector<8x96xf32> to vector<8x64xf32>
    %19 = arith.addf %17, %18 : vector<8x64xf32>
    %20 = arith.negf %19 : vector<8x64xf32>
    %21 = math.exp %20 : vector<8x64xf32>
    %cst_12 = arith.constant 1.000000e+00 : f32
    %22 = vector.broadcast %cst_12 : f32 to vector<8x64xf32>
    %23 = arith.addf %22, %21 : vector<8x64xf32>
    %24 = arith.divf %22, %23 : vector<8x64xf32>
    %25 = vector.extract_strided_slice %24 {offsets = [0, 0], sizes = [8, 32], strides = [1, 1]} : vector<8x64xf32> to vector<8x32xf32>
    %26 = vector.extract_strided_slice %24 {offsets = [0, 32], sizes = [8, 32], strides = [1, 1]} : vector<8x64xf32> to vector<8x32xf32>
    %27 = vector.extract_strided_slice %14 {offsets = [0, 64], sizes = [8, 32], strides = [1, 1]} : vector<8x96xf32> to vector<8x32xf32>
    %28 = vector.extract_strided_slice %16 {offsets = [0, 64], sizes = [8, 32], strides = [1, 1]} : vector<8x96xf32> to vector<8x32xf32>
    %29 = arith.addf %28, %11 : vector<8x32xf32>
    %30 = arith.mulf %25, %29 : vector<8x32xf32>
    %31 = arith.addf %27, %30 : vector<8x32xf32>
    %32 = math.tanh %31 : vector<8x32xf32>
    %cst_13 = arith.constant 1.000000e+00 : f32
    %33 = vector.broadcast %cst_13 : f32 to vector<8x32xf32>
    %34 = arith.subf %33, %26 : vector<8x32xf32>
    %35 = arith.mulf %34, %32 : vector<8x32xf32>
    %36 = arith.mulf %26, %12 : vector<8x32xf32>
    %37 = arith.addf %35, %36 : vector<8x32xf32>
    %38 = vector.extract_strided_slice %37 {offsets = [0, 0], sizes = [8, 16], strides = [1, 1]} : vector<8x32xf32> to vector<8x16xf32>
    %c0_14 = arith.constant 0 : index
    %c0_15 = arith.constant 0 : index
    %c0_16 = arith.constant 0 : index
    %39 = vector.load %arg11[%c0_14, %c0_15, %c0_16] : memref<8x8x16xf32, #tpu.memory_space<vmem>>, vector<1x8x16xf32>
    %40 = vector.shape_cast %39 : vector<1x8x16xf32> to vector<8x16xf32>
    %41 = vector.shape_cast %38 : vector<8x16xf32> to vector<1x8x16xf32>
    tpu.vector_store %arg11[%c0_14, %c0_15, %c0_16], %41 {strides = array<i32>} : memref<8x8x16xf32, #tpu.memory_space<vmem>>, vector<1x8x16xf32>,
    %42 = vector.extract_strided_slice %37 {offsets = [0, 16], sizes = [8, 16], strides = [1, 1]} : vector<8x32xf32> to vector<8x16xf32>
    %c7 = arith.constant 7 : index
    %c0_17 = arith.constant 0 : index
    %c0_18 = arith.constant 0 : index
    %43 = vector.load %arg12[%c7, %c0_17, %c0_18] : memref<8x8x16xf32, #tpu.memory_space<vmem>>, vector<1x8x16xf32>
    %44 = vector.shape_cast %43 : vector<1x8x16xf32> to vector<8x16xf32>
    %45 = vector.shape_cast %42 : vector<8x16xf32> to vector<1x8x16xf32>
    tpu.vector_store %arg12[%c7, %c0_17, %c0_18], %45 {strides = array<i32>} : memref<8x8x16xf32, #tpu.memory_space<vmem>>, vector<1x8x16xf32>,
    %46 = vector.extract_strided_slice %7 {offsets = [1, 0, 0], sizes = [1, 8, 96], strides = [1, 1, 1]} : vector<8x8x96xf32> to vector<1x8x96xf32>
    %47 = vector.shape_cast %46 : vector<1x8x96xf32> to vector<8x96xf32>
    %48 = arith.truncf %37 : vector<8x32xf32> to vector<8x32xbf16>
    %cst_19 = arith.constant dense<0.000000e+00> : vector<8x96xf32>
    %49 = tpu.matmul %48, %8, %cst_19 {dimension_numbers = #tpu.dot_dimension_numbers<[1], [0], [0], [1], [0, 0, 1, 1], [], []>} : vector<8x32xbf16>, vector<32x96xbf16>, vector<8x96xf32> -> vector<8x96xf32>
    %50 = vector.extract_strided_slice %47 {offsets = [0, 0], sizes = [8, 64], strides = [1, 1]} : vector<8x96xf32> to vector<8x64xf32>
    %51 = vector.extract_strided_slice %49 {offsets = [0, 0], sizes = [8, 64], strides = [1, 1]} : vector<8x96xf32> to vector<8x64xf32>
    %52 = arith.addf %50, %51 : vector<8x64xf32>
    %53 = arith.negf %52 : vector<8x64xf32>
    %54 = math.exp %53 : vector<8x64xf32>
    %cst_20 = arith.constant 1.000000e+00 : f32
    %55 = vector.broadcast %cst_20 : f32 to vector<8x64xf32>
    %56 = arith.addf %55, %54 : vector<8x64xf32>
    %57 = arith.divf %55, %56 : vector<8x64xf32>
    %58 = vector.extract_strided_slice %57 {offsets = [0, 0], sizes = [8, 32], strides = [1, 1]} : vector<8x64xf32> to vector<8x32xf32>
    %59 = vector.extract_strided_slice %57 {offsets = [0, 32], sizes = [8, 32], strides = [1, 1]} : vector<8x64xf32> to vector<8x32xf32>
    %60 = vector.extract_strided_slice %47 {offsets = [0, 64], sizes = [8, 32], strides = [1, 1]} : vector<8x96xf32> to vector<8x32xf32>
    %61 = vector.extract_strided_slice %49 {offsets = [0, 64], sizes = [8, 32], strides = [1, 1]} : vector<8x96xf32> to vector<8x32xf32>
    %62 = arith.addf %61, %11 : vector<8x32xf32>
    %63 = arith.mulf %58, %62 : vector<8x32xf32>
    %64 = arith.addf %60, %63 : vector<8x32xf32>
    %65 = math.tanh %64 : vector<8x32xf32>
    %cst_21 = arith.constant 1.000000e+00 : f32
    %66 = vector.broadcast %cst_21 : f32 to vector<8x32xf32>
    %67 = arith.subf %66, %59 : vector<8x32xf32>
    %68 = arith.mulf %67, %65 : vector<8x32xf32>
    %69 = arith.mulf %59, %37 : vector<8x32xf32>
    %70 = arith.addf %68, %69 : vector<8x32xf32>
    %71 = vector.extract_strided_slice %70 {offsets = [0, 0], sizes = [8, 16], strides = [1, 1]} : vector<8x32xf32> to vector<8x16xf32>
    %c1 = arith.constant 1 : index
    %c0_22 = arith.constant 0 : index
    %c0_23 = arith.constant 0 : index
    %72 = vector.load %arg11[%c1, %c0_22, %c0_23] : memref<8x8x16xf32, #tpu.memory_space<vmem>>, vector<1x8x16xf32>
    %73 = vector.shape_cast %72 : vector<1x8x16xf32> to vector<8x16xf32>
    %74 = vector.shape_cast %71 : vector<8x16xf32> to vector<1x8x16xf32>
    tpu.vector_store %arg11[%c1, %c0_22, %c0_23], %74 {strides = array<i32>} : memref<8x8x16xf32, #tpu.memory_space<vmem>>, vector<1x8x16xf32>,
    %75 = vector.extract_strided_slice %70 {offsets = [0, 16], sizes = [8, 16], strides = [1, 1]} : vector<8x32xf32> to vector<8x16xf32>
    %c6 = arith.constant 6 : index
    %c0_24 = arith.constant 0 : index
    %c0_25 = arith.constant 0 : index
    %76 = vector.load %arg12[%c6, %c0_24, %c0_25] : memref<8x8x16xf32, #tpu.memory_space<vmem>>, vector<1x8x16xf32>
    %77 = vector.shape_cast %76 : vector<1x8x16xf32> to vector<8x16xf32>
    %78 = vector.shape_cast %75 : vector<8x16xf32> to vector<1x8x16xf32>
    tpu.vector_store %arg12[%c6, %c0_24, %c0_25], %78 {strides = array<i32>} : memref<8x8x16xf32, #tpu.memory_space<vmem>>, vector<1x8x16xf32>,
    %79 = vector.extract_strided_slice %7 {offsets = [2, 0, 0], sizes = [1, 8, 96], strides = [1, 1, 1]} : vector<8x8x96xf32> to vector<1x8x96xf32>
    %80 = vector.shape_cast %79 : vector<1x8x96xf32> to vector<8x96xf32>
    %81 = arith.truncf %70 : vector<8x32xf32> to vector<8x32xbf16>
    %cst_26 = arith.constant dense<0.000000e+00> : vector<8x96xf32>
    %82 = tpu.matmul %81, %8, %cst_26 {dimension_numbers = #tpu.dot_dimension_numbers<[1], [0], [0], [1], [0, 0, 1, 1], [], []>} : vector<8x32xbf16>, vector<32x96xbf16>, vector<8x96xf32> -> vector<8x96xf32>
    %83 = vector.extract_strided_slice %80 {offsets = [0, 0], sizes = [8, 64], strides = [1, 1]} : vector<8x96xf32> to vector<8x64xf32>
    %84 = vector.extract_strided_slice %82 {offsets = [0, 0], sizes = [8, 64], strides = [1, 1]} : vector<8x96xf32> to vector<8x64xf32>
    %85 = arith.addf %83, %84 : vector<8x64xf32>
    %86 = arith.negf %85 : vector<8x64xf32>
    %87 = math.exp %86 : vector<8x64xf32>
    %cst_27 = arith.constant 1.000000e+00 : f32
    %88 = vector.broadcast %cst_27 : f32 to vector<8x64xf32>
    %89 = arith.addf %88, %87 : vector<8x64xf32>
    %90 = arith.divf %88, %89 : vector<8x64xf32>
    %91 = vector.extract_strided_slice %90 {offsets = [0, 0], sizes = [8, 32], strides = [1, 1]} : vector<8x64xf32> to vector<8x32xf32>
    %92 = vector.extract_strided_slice %90 {offsets = [0, 32], sizes = [8, 32], strides = [1, 1]} : vector<8x64xf32> to vector<8x32xf32>
    %93 = vector.extract_strided_slice %80 {offsets = [0, 64], sizes = [8, 32], strides = [1, 1]} : vector<8x96xf32> to vector<8x32xf32>
    %94 = vector.extract_strided_slice %82 {offsets = [0, 64], sizes = [8, 32], strides = [1, 1]} : vector<8x96xf32> to vector<8x32xf32>
    %95 = arith.addf %94, %11 : vector<8x32xf32>
    %96 = arith.mulf %91, %95 : vector<8x32xf32>
    %97 = arith.addf %93, %96 : vector<8x32xf32>
    %98 = math.tanh %97 : vector<8x32xf32>
    %cst_28 = arith.constant 1.000000e+00 : f32
    %99 = vector.broadcast %cst_28 : f32 to vector<8x32xf32>
    %100 = arith.subf %99, %92 : vector<8x32xf32>
    %101 = arith.mulf %100, %98 : vector<8x32xf32>
    %102 = arith.mulf %92, %70 : vector<8x32xf32>
    %103 = arith.addf %101, %102 : vector<8x32xf32>
    %104 = vector.extract_strided_slice %103 {offsets = [0, 0], sizes = [8, 16], strides = [1, 1]} : vector<8x32xf32> to vector<8x16xf32>
    %c2 = arith.constant 2 : index
    %c0_29 = arith.constant 0 : index
    %c0_30 = arith.constant 0 : index
    %105 = vector.load %arg11[%c2, %c0_29, %c0_30] : memref<8x8x16xf32, #tpu.memory_space<vmem>>, vector<1x8x16xf32>
    %106 = vector.shape_cast %105 : vector<1x8x16xf32> to vector<8x16xf32>
    %107 = vector.shape_cast %104 : vector<8x16xf32> to vector<1x8x16xf32>
    tpu.vector_store %arg11[%c2, %c0_29, %c0_30], %107 {strides = array<i32>} : memref<8x8x16xf32, #tpu.memory_space<vmem>>, vector<1x8x16xf32>,
    %108 = vector.extract_strided_slice %103 {offsets = [0, 16], sizes = [8, 16], strides = [1, 1]} : vector<8x32xf32> to vector<8x16xf32>
    %c5 = arith.constant 5 : index
    %c0_31 = arith.constant 0 : index
    %c0_32 = arith.constant 0 : index
    %109 = vector.load %arg12[%c5, %c0_31, %c0_32] : memref<8x8x16xf32, #tpu.memory_space<vmem>>, vector<1x8x16xf32>
    %110 = vector.shape_cast %109 : vector<1x8x16xf32> to vector<8x16xf32>
    %111 = vector.shape_cast %108 : vector<8x16xf32> to vector<1x8x16xf32>
    tpu.vector_store %arg12[%c5, %c0_31, %c0_32], %111 {strides = array<i32>} : memref<8x8x16xf32, #tpu.memory_space<vmem>>, vector<1x8x16xf32>,
    %112 = vector.extract_strided_slice %7 {offsets = [3, 0, 0], sizes = [1, 8, 96], strides = [1, 1, 1]} : vector<8x8x96xf32> to vector<1x8x96xf32>
    %113 = vector.shape_cast %112 : vector<1x8x96xf32> to vector<8x96xf32>
    %114 = arith.truncf %103 : vector<8x32xf32> to vector<8x32xbf16>
    %cst_33 = arith.constant dense<0.000000e+00> : vector<8x96xf32>
    %115 = tpu.matmul %114, %8, %cst_33 {dimension_numbers = #tpu.dot_dimension_numbers<[1], [0], [0], [1], [0, 0, 1, 1], [], []>} : vector<8x32xbf16>, vector<32x96xbf16>, vector<8x96xf32> -> vector<8x96xf32>
    %116 = vector.extract_strided_slice %113 {offsets = [0, 0], sizes = [8, 64], strides = [1, 1]} : vector<8x96xf32> to vector<8x64xf32>
    %117 = vector.extract_strided_slice %115 {offsets = [0, 0], sizes = [8, 64], strides = [1, 1]} : vector<8x96xf32> to vector<8x64xf32>
    %118 = arith.addf %116, %117 : vector<8x64xf32>
    %119 = arith.negf %118 : vector<8x64xf32>
    %120 = math.exp %119 : vector<8x64xf32>
    %cst_34 = arith.constant 1.000000e+00 : f32
    %121 = vector.broadcast %cst_34 : f32 to vector<8x64xf32>
    %122 = arith.addf %121, %120 : vector<8x64xf32>
    %123 = arith.divf %121, %122 : vector<8x64xf32>
    %124 = vector.extract_strided_slice %123 {offsets = [0, 0], sizes = [8, 32], strides = [1, 1]} : vector<8x64xf32> to vector<8x32xf32>
    %125 = vector.extract_strided_slice %123 {offsets = [0, 32], sizes = [8, 32], strides = [1, 1]} : vector<8x64xf32> to vector<8x32xf32>
    %126 = vector.extract_strided_slice %113 {offsets = [0, 64], sizes = [8, 32], strides = [1, 1]} : vector<8x96xf32> to vector<8x32xf32>
    %127 = vector.extract_strided_slice %115 {offsets = [0, 64], sizes = [8, 32], strides = [1, 1]} : vector<8x96xf32> to vector<8x32xf32>
    %128 = arith.addf %127, %11 : vector<8x32xf32>
    %129 = arith.mulf %124, %128 : vector<8x32xf32>
    %130 = arith.addf %126, %129 : vector<8x32xf32>
    %131 = math.tanh %130 : vector<8x32xf32>
    %cst_35 = arith.constant 1.000000e+00 : f32
    %132 = vector.broadcast %cst_35 : f32 to vector<8x32xf32>
    %133 = arith.subf %132, %125 : vector<8x32xf32>
    %134 = arith.mulf %133, %131 : vector<8x32xf32>
    %135 = arith.mulf %125, %103 : vector<8x32xf32>
    %136 = arith.addf %134, %135 : vector<8x32xf32>
    %137 = vector.extract_strided_slice %136 {offsets = [0, 0], sizes = [8, 16], strides = [1, 1]} : vector<8x32xf32> to vector<8x16xf32>
    %c3 = arith.constant 3 : index
    %c0_36 = arith.constant 0 : index
    %c0_37 = arith.constant 0 : index
    %138 = vector.load %arg11[%c3, %c0_36, %c0_37] : memref<8x8x16xf32, #tpu.memory_space<vmem>>, vector<1x8x16xf32>
    %139 = vector.shape_cast %138 : vector<1x8x16xf32> to vector<8x16xf32>
    %140 = vector.shape_cast %137 : vector<8x16xf32> to vector<1x8x16xf32>
    tpu.vector_store %arg11[%c3, %c0_36, %c0_37], %140 {strides = array<i32>} : memref<8x8x16xf32, #tpu.memory_space<vmem>>, vector<1x8x16xf32>,
    %141 = vector.extract_strided_slice %136 {offsets = [0, 16], sizes = [8, 16], strides = [1, 1]} : vector<8x32xf32> to vector<8x16xf32>
    %c4 = arith.constant 4 : index
    %c0_38 = arith.constant 0 : index
    %c0_39 = arith.constant 0 : index
    %142 = vector.load %arg12[%c4, %c0_38, %c0_39] : memref<8x8x16xf32, #tpu.memory_space<vmem>>, vector<1x8x16xf32>
    %143 = vector.shape_cast %142 : vector<1x8x16xf32> to vector<8x16xf32>
    %144 = vector.shape_cast %141 : vector<8x16xf32> to vector<1x8x16xf32>
    tpu.vector_store %arg12[%c4, %c0_38, %c0_39], %144 {strides = array<i32>} : memref<8x8x16xf32, #tpu.memory_space<vmem>>, vector<1x8x16xf32>,
    %145 = vector.extract_strided_slice %7 {offsets = [4, 0, 0], sizes = [1, 8, 96], strides = [1, 1, 1]} : vector<8x8x96xf32> to vector<1x8x96xf32>
    %146 = vector.shape_cast %145 : vector<1x8x96xf32> to vector<8x96xf32>
    %147 = arith.truncf %136 : vector<8x32xf32> to vector<8x32xbf16>
    %cst_40 = arith.constant dense<0.000000e+00> : vector<8x96xf32>
    %148 = tpu.matmul %147, %8, %cst_40 {dimension_numbers = #tpu.dot_dimension_numbers<[1], [0], [0], [1], [0, 0, 1, 1], [], []>} : vector<8x32xbf16>, vector<32x96xbf16>, vector<8x96xf32> -> vector<8x96xf32>
    %149 = vector.extract_strided_slice %146 {offsets = [0, 0], sizes = [8, 64], strides = [1, 1]} : vector<8x96xf32> to vector<8x64xf32>
    %150 = vector.extract_strided_slice %148 {offsets = [0, 0], sizes = [8, 64], strides = [1, 1]} : vector<8x96xf32> to vector<8x64xf32>
    %151 = arith.addf %149, %150 : vector<8x64xf32>
    %152 = arith.negf %151 : vector<8x64xf32>
    %153 = math.exp %152 : vector<8x64xf32>
    %cst_41 = arith.constant 1.000000e+00 : f32
    %154 = vector.broadcast %cst_41 : f32 to vector<8x64xf32>
    %155 = arith.addf %154, %153 : vector<8x64xf32>
    %156 = arith.divf %154, %155 : vector<8x64xf32>
    %157 = vector.extract_strided_slice %156 {offsets = [0, 0], sizes = [8, 32], strides = [1, 1]} : vector<8x64xf32> to vector<8x32xf32>
    %158 = vector.extract_strided_slice %156 {offsets = [0, 32], sizes = [8, 32], strides = [1, 1]} : vector<8x64xf32> to vector<8x32xf32>
    %159 = vector.extract_strided_slice %146 {offsets = [0, 64], sizes = [8, 32], strides = [1, 1]} : vector<8x96xf32> to vector<8x32xf32>
    %160 = vector.extract_strided_slice %148 {offsets = [0, 64], sizes = [8, 32], strides = [1, 1]} : vector<8x96xf32> to vector<8x32xf32>
    %161 = arith.addf %160, %11 : vector<8x32xf32>
    %162 = arith.mulf %157, %161 : vector<8x32xf32>
    %163 = arith.addf %159, %162 : vector<8x32xf32>
    %164 = math.tanh %163 : vector<8x32xf32>
    %cst_42 = arith.constant 1.000000e+00 : f32
    %165 = vector.broadcast %cst_42 : f32 to vector<8x32xf32>
    %166 = arith.subf %165, %158 : vector<8x32xf32>
    %167 = arith.mulf %166, %164 : vector<8x32xf32>
    %168 = arith.mulf %158, %136 : vector<8x32xf32>
    %169 = arith.addf %167, %168 : vector<8x32xf32>
    %170 = vector.extract_strided_slice %169 {offsets = [0, 0], sizes = [8, 16], strides = [1, 1]} : vector<8x32xf32> to vector<8x16xf32>
    %c4_43 = arith.constant 4 : index
    %c0_44 = arith.constant 0 : index
    %c0_45 = arith.constant 0 : index
    %171 = vector.load %arg11[%c4_43, %c0_44, %c0_45] : memref<8x8x16xf32, #tpu.memory_space<vmem>>, vector<1x8x16xf32>
    %172 = vector.shape_cast %171 : vector<1x8x16xf32> to vector<8x16xf32>
    %173 = vector.shape_cast %170 : vector<8x16xf32> to vector<1x8x16xf32>
    tpu.vector_store %arg11[%c4_43, %c0_44, %c0_45], %173 {strides = array<i32>} : memref<8x8x16xf32, #tpu.memory_space<vmem>>, vector<1x8x16xf32>,
    %174 = vector.extract_strided_slice %169 {offsets = [0, 16], sizes = [8, 16], strides = [1, 1]} : vector<8x32xf32> to vector<8x16xf32>
    %c3_46 = arith.constant 3 : index
    %c0_47 = arith.constant 0 : index
    %c0_48 = arith.constant 0 : index
    %175 = vector.load %arg12[%c3_46, %c0_47, %c0_48] : memref<8x8x16xf32, #tpu.memory_space<vmem>>, vector<1x8x16xf32>
    %176 = vector.shape_cast %175 : vector<1x8x16xf32> to vector<8x16xf32>
    %177 = vector.shape_cast %174 : vector<8x16xf32> to vector<1x8x16xf32>
    tpu.vector_store %arg12[%c3_46, %c0_47, %c0_48], %177 {strides = array<i32>} : memref<8x8x16xf32, #tpu.memory_space<vmem>>, vector<1x8x16xf32>,
    %178 = vector.extract_strided_slice %7 {offsets = [5, 0, 0], sizes = [1, 8, 96], strides = [1, 1, 1]} : vector<8x8x96xf32> to vector<1x8x96xf32>
    %179 = vector.shape_cast %178 : vector<1x8x96xf32> to vector<8x96xf32>
    %180 = arith.truncf %169 : vector<8x32xf32> to vector<8x32xbf16>
    %cst_49 = arith.constant dense<0.000000e+00> : vector<8x96xf32>
    %181 = tpu.matmul %180, %8, %cst_49 {dimension_numbers = #tpu.dot_dimension_numbers<[1], [0], [0], [1], [0, 0, 1, 1], [], []>} : vector<8x32xbf16>, vector<32x96xbf16>, vector<8x96xf32> -> vector<8x96xf32>
    %182 = vector.extract_strided_slice %179 {offsets = [0, 0], sizes = [8, 64], strides = [1, 1]} : vector<8x96xf32> to vector<8x64xf32>
    %183 = vector.extract_strided_slice %181 {offsets = [0, 0], sizes = [8, 64], strides = [1, 1]} : vector<8x96xf32> to vector<8x64xf32>
    %184 = arith.addf %182, %183 : vector<8x64xf32>
    %185 = arith.negf %184 : vector<8x64xf32>
    %186 = math.exp %185 : vector<8x64xf32>
    %cst_50 = arith.constant 1.000000e+00 : f32
    %187 = vector.broadcast %cst_50 : f32 to vector<8x64xf32>
    %188 = arith.addf %187, %186 : vector<8x64xf32>
    %189 = arith.divf %187, %188 : vector<8x64xf32>
    %190 = vector.extract_strided_slice %189 {offsets = [0, 0], sizes = [8, 32], strides = [1, 1]} : vector<8x64xf32> to vector<8x32xf32>
    %191 = vector.extract_strided_slice %189 {offsets = [0, 32], sizes = [8, 32], strides = [1, 1]} : vector<8x64xf32> to vector<8x32xf32>
    %192 = vector.extract_strided_slice %179 {offsets = [0, 64], sizes = [8, 32], strides = [1, 1]} : vector<8x96xf32> to vector<8x32xf32>
    %193 = vector.extract_strided_slice %181 {offsets = [0, 64], sizes = [8, 32], strides = [1, 1]} : vector<8x96xf32> to vector<8x32xf32>
    %194 = arith.addf %193, %11 : vector<8x32xf32>
    %195 = arith.mulf %190, %194 : vector<8x32xf32>
    %196 = arith.addf %192, %195 : vector<8x32xf32>
    %197 = math.tanh %196 : vector<8x32xf32>
    %cst_51 = arith.constant 1.000000e+00 : f32
    %198 = vector.broadcast %cst_51 : f32 to vector<8x32xf32>
    %199 = arith.subf %198, %191 : vector<8x32xf32>
    %200 = arith.mulf %199, %197 : vector<8x32xf32>
    %201 = arith.mulf %191, %169 : vector<8x32xf32>
    %202 = arith.addf %200, %201 : vector<8x32xf32>
    %203 = vector.extract_strided_slice %202 {offsets = [0, 0], sizes = [8, 16], strides = [1, 1]} : vector<8x32xf32> to vector<8x16xf32>
    %c5_52 = arith.constant 5 : index
    %c0_53 = arith.constant 0 : index
    %c0_54 = arith.constant 0 : index
    %204 = vector.load %arg11[%c5_52, %c0_53, %c0_54] : memref<8x8x16xf32, #tpu.memory_space<vmem>>, vector<1x8x16xf32>
    %205 = vector.shape_cast %204 : vector<1x8x16xf32> to vector<8x16xf32>
    %206 = vector.shape_cast %203 : vector<8x16xf32> to vector<1x8x16xf32>
    tpu.vector_store %arg11[%c5_52, %c0_53, %c0_54], %206 {strides = array<i32>} : memref<8x8x16xf32, #tpu.memory_space<vmem>>, vector<1x8x16xf32>,
    %207 = vector.extract_strided_slice %202 {offsets = [0, 16], sizes = [8, 16], strides = [1, 1]} : vector<8x32xf32> to vector<8x16xf32>
    %c2_55 = arith.constant 2 : index
    %c0_56 = arith.constant 0 : index
    %c0_57 = arith.constant 0 : index
    %208 = vector.load %arg12[%c2_55, %c0_56, %c0_57] : memref<8x8x16xf32, #tpu.memory_space<vmem>>, vector<1x8x16xf32>
    %209 = vector.shape_cast %208 : vector<1x8x16xf32> to vector<8x16xf32>
    %210 = vector.shape_cast %207 : vector<8x16xf32> to vector<1x8x16xf32>
    tpu.vector_store %arg12[%c2_55, %c0_56, %c0_57], %210 {strides = array<i32>} : memref<8x8x16xf32, #tpu.memory_space<vmem>>, vector<1x8x16xf32>,
    %211 = vector.extract_strided_slice %7 {offsets = [6, 0, 0], sizes = [1, 8, 96], strides = [1, 1, 1]} : vector<8x8x96xf32> to vector<1x8x96xf32>
    %212 = vector.shape_cast %211 : vector<1x8x96xf32> to vector<8x96xf32>
    %213 = arith.truncf %202 : vector<8x32xf32> to vector<8x32xbf16>
    %cst_58 = arith.constant dense<0.000000e+00> : vector<8x96xf32>
    %214 = tpu.matmul %213, %8, %cst_58 {dimension_numbers = #tpu.dot_dimension_numbers<[1], [0], [0], [1], [0, 0, 1, 1], [], []>} : vector<8x32xbf16>, vector<32x96xbf16>, vector<8x96xf32> -> vector<8x96xf32>
    %215 = vector.extract_strided_slice %212 {offsets = [0, 0], sizes = [8, 64], strides = [1, 1]} : vector<8x96xf32> to vector<8x64xf32>
    %216 = vector.extract_strided_slice %214 {offsets = [0, 0], sizes = [8, 64], strides = [1, 1]} : vector<8x96xf32> to vector<8x64xf32>
    %217 = arith.addf %215, %216 : vector<8x64xf32>
    %218 = arith.negf %217 : vector<8x64xf32>
    %219 = math.exp %218 : vector<8x64xf32>
    %cst_59 = arith.constant 1.000000e+00 : f32
    %220 = vector.broadcast %cst_59 : f32 to vector<8x64xf32>
    %221 = arith.addf %220, %219 : vector<8x64xf32>
    %222 = arith.divf %220, %221 : vector<8x64xf32>
    %223 = vector.extract_strided_slice %222 {offsets = [0, 0], sizes = [8, 32], strides = [1, 1]} : vector<8x64xf32> to vector<8x32xf32>
    %224 = vector.extract_strided_slice %222 {offsets = [0, 32], sizes = [8, 32], strides = [1, 1]} : vector<8x64xf32> to vector<8x32xf32>
    %225 = vector.extract_strided_slice %212 {offsets = [0, 64], sizes = [8, 32], strides = [1, 1]} : vector<8x96xf32> to vector<8x32xf32>
    %226 = vector.extract_strided_slice %214 {offsets = [0, 64], sizes = [8, 32], strides = [1, 1]} : vector<8x96xf32> to vector<8x32xf32>
    %227 = arith.addf %226, %11 : vector<8x32xf32>
    %228 = arith.mulf %223, %227 : vector<8x32xf32>
    %229 = arith.addf %225, %228 : vector<8x32xf32>
    %230 = math.tanh %229 : vector<8x32xf32>
    %cst_60 = arith.constant 1.000000e+00 : f32
    %231 = vector.broadcast %cst_60 : f32 to vector<8x32xf32>
    %232 = arith.subf %231, %224 : vector<8x32xf32>
    %233 = arith.mulf %232, %230 : vector<8x32xf32>
    %234 = arith.mulf %224, %202 : vector<8x32xf32>
    %235 = arith.addf %233, %234 : vector<8x32xf32>
    %236 = vector.extract_strided_slice %235 {offsets = [0, 0], sizes = [8, 16], strides = [1, 1]} : vector<8x32xf32> to vector<8x16xf32>
    %c6_61 = arith.constant 6 : index
    %c0_62 = arith.constant 0 : index
    %c0_63 = arith.constant 0 : index
    %237 = vector.load %arg11[%c6_61, %c0_62, %c0_63] : memref<8x8x16xf32, #tpu.memory_space<vmem>>, vector<1x8x16xf32>
    %238 = vector.shape_cast %237 : vector<1x8x16xf32> to vector<8x16xf32>
    %239 = vector.shape_cast %236 : vector<8x16xf32> to vector<1x8x16xf32>
    tpu.vector_store %arg11[%c6_61, %c0_62, %c0_63], %239 {strides = array<i32>} : memref<8x8x16xf32, #tpu.memory_space<vmem>>, vector<1x8x16xf32>,
    %240 = vector.extract_strided_slice %235 {offsets = [0, 16], sizes = [8, 16], strides = [1, 1]} : vector<8x32xf32> to vector<8x16xf32>
    %c1_64 = arith.constant 1 : index
    %c0_65 = arith.constant 0 : index
    %c0_66 = arith.constant 0 : index
    %241 = vector.load %arg12[%c1_64, %c0_65, %c0_66] : memref<8x8x16xf32, #tpu.memory_space<vmem>>, vector<1x8x16xf32>
    %242 = vector.shape_cast %241 : vector<1x8x16xf32> to vector<8x16xf32>
    %243 = vector.shape_cast %240 : vector<8x16xf32> to vector<1x8x16xf32>
    tpu.vector_store %arg12[%c1_64, %c0_65, %c0_66], %243 {strides = array<i32>} : memref<8x8x16xf32, #tpu.memory_space<vmem>>, vector<1x8x16xf32>,
    %244 = vector.extract_strided_slice %7 {offsets = [7, 0, 0], sizes = [1, 8, 96], strides = [1, 1, 1]} : vector<8x8x96xf32> to vector<1x8x96xf32>
    %245 = vector.shape_cast %244 : vector<1x8x96xf32> to vector<8x96xf32>
    %246 = arith.truncf %235 : vector<8x32xf32> to vector<8x32xbf16>
    %cst_67 = arith.constant dense<0.000000e+00> : vector<8x96xf32>
    %247 = tpu.matmul %246, %8, %cst_67 {dimension_numbers = #tpu.dot_dimension_numbers<[1], [0], [0], [1], [0, 0, 1, 1], [], []>} : vector<8x32xbf16>, vector<32x96xbf16>, vector<8x96xf32> -> vector<8x96xf32>
    %248 = vector.extract_strided_slice %245 {offsets = [0, 0], sizes = [8, 64], strides = [1, 1]} : vector<8x96xf32> to vector<8x64xf32>
    %249 = vector.extract_strided_slice %247 {offsets = [0, 0], sizes = [8, 64], strides = [1, 1]} : vector<8x96xf32> to vector<8x64xf32>
    %250 = arith.addf %248, %249 : vector<8x64xf32>
    %251 = arith.negf %250 : vector<8x64xf32>
    %252 = math.exp %251 : vector<8x64xf32>
    %cst_68 = arith.constant 1.000000e+00 : f32
    %253 = vector.broadcast %cst_68 : f32 to vector<8x64xf32>
    %254 = arith.addf %253, %252 : vector<8x64xf32>
    %255 = arith.divf %253, %254 : vector<8x64xf32>
    %256 = vector.extract_strided_slice %255 {offsets = [0, 0], sizes = [8, 32], strides = [1, 1]} : vector<8x64xf32> to vector<8x32xf32>
    %257 = vector.extract_strided_slice %255 {offsets = [0, 32], sizes = [8, 32], strides = [1, 1]} : vector<8x64xf32> to vector<8x32xf32>
    %258 = vector.extract_strided_slice %245 {offsets = [0, 64], sizes = [8, 32], strides = [1, 1]} : vector<8x96xf32> to vector<8x32xf32>
    %259 = vector.extract_strided_slice %247 {offsets = [0, 64], sizes = [8, 32], strides = [1, 1]} : vector<8x96xf32> to vector<8x32xf32>
    %260 = arith.addf %259, %11 : vector<8x32xf32>
    %261 = arith.mulf %256, %260 : vector<8x32xf32>
    %262 = arith.addf %258, %261 : vector<8x32xf32>
    %263 = math.tanh %262 : vector<8x32xf32>
    %cst_69 = arith.constant 1.000000e+00 : f32
    %264 = vector.broadcast %cst_69 : f32 to vector<8x32xf32>
    %265 = arith.subf %264, %257 : vector<8x32xf32>
    %266 = arith.mulf %265, %263 : vector<8x32xf32>
    %267 = arith.mulf %257, %235 : vector<8x32xf32>
    %268 = arith.addf %266, %267 : vector<8x32xf32>
    %269 = vector.extract_strided_slice %268 {offsets = [0, 0], sizes = [8, 16], strides = [1, 1]} : vector<8x32xf32> to vector<8x16xf32>
    %c7_70 = arith.constant 7 : index
    %c0_71 = arith.constant 0 : index
    %c0_72 = arith.constant 0 : index
    %270 = vector.load %arg11[%c7_70, %c0_71, %c0_72] : memref<8x8x16xf32, #tpu.memory_space<vmem>>, vector<1x8x16xf32>
    %271 = vector.shape_cast %270 : vector<1x8x16xf32> to vector<8x16xf32>
    %272 = vector.shape_cast %269 : vector<8x16xf32> to vector<1x8x16xf32>
    tpu.vector_store %arg11[%c7_70, %c0_71, %c0_72], %272 {strides = array<i32>} : memref<8x8x16xf32, #tpu.memory_space<vmem>>, vector<1x8x16xf32>,
    %273 = vector.extract_strided_slice %268 {offsets = [0, 16], sizes = [8, 16], strides = [1, 1]} : vector<8x32xf32> to vector<8x16xf32>
    %c0_73 = arith.constant 0 : index
    %c0_74 = arith.constant 0 : index
    %c0_75 = arith.constant 0 : index
    %274 = vector.load %arg12[%c0_73, %c0_74, %c0_75] : memref<8x8x16xf32, #tpu.memory_space<vmem>>, vector<1x8x16xf32>
    %275 = vector.shape_cast %274 : vector<1x8x16xf32> to vector<8x16xf32>
    %276 = vector.shape_cast %273 : vector<8x16xf32> to vector<1x8x16xf32>
    tpu.vector_store %arg12[%c0_73, %c0_74, %c0_75], %276 {strides = array<i32>} : memref<8x8x16xf32, #tpu.memory_space<vmem>>, vector<1x8x16xf32>,
    %c0_76 = arith.constant 0 : index
    %c0_77 = arith.constant 0 : index
    %c0_78 = arith.constant 0 : index
    %277 = vector.load %arg11[%c0_76, %c0_77, %c0_78] : memref<8x8x16xf32, #tpu.memory_space<vmem>>, vector<8x8x16xf32>
    %c0_79 = arith.constant 0 : index
    %c0_80 = arith.constant 0 : index
    %c0_81 = arith.constant 0 : index
    %278 = vector.load %arg12[%c0_79, %c0_80, %c0_81] : memref<8x8x16xf32, #tpu.memory_space<vmem>>, vector<8x8x16xf32>
    %279 = vector.shape_cast %277 : vector<8x8x16xf32> to vector<64x16xf32>
    %280 = arith.truncf %279 : vector<64x16xf32> to vector<64x16xbf16>
    %c0_82 = arith.constant 0 : index
    %c0_83 = arith.constant 0 : index
    %281 = vector.load %arg6[%c0_82, %c0_83] : memref<16x32xbf16, #tpu.memory_space<vmem>>, vector<16x32xbf16>
    %cst_84 = arith.constant dense<0.000000e+00> : vector<64x32xf32>
    %282 = tpu.matmul %280, %281, %cst_84 {dimension_numbers = #tpu.dot_dimension_numbers<[1], [0], [0], [1], [0, 0, 1, 1], [], []>} : vector<64x16xbf16>, vector<16x32xbf16>, vector<64x32xf32> -> vector<64x32xf32>
    %283 = vector.shape_cast %278 : vector<8x8x16xf32> to vector<64x16xf32>
    %284 = arith.truncf %283 : vector<64x16xf32> to vector<64x16xbf16>
    %c0_85 = arith.constant 0 : index
    %c0_86 = arith.constant 0 : index
    %285 = vector.load %arg7[%c0_85, %c0_86] : memref<16x32xbf16, #tpu.memory_space<vmem>>, vector<16x32xbf16>
    %cst_87 = arith.constant dense<0.000000e+00> : vector<64x32xf32>
    %286 = tpu.matmul %284, %285, %cst_87 {dimension_numbers = #tpu.dot_dimension_numbers<[1], [0], [0], [1], [0, 0, 1, 1], [], []>} : vector<64x16xbf16>, vector<16x32xbf16>, vector<64x32xf32> -> vector<64x32xf32>
    %287 = arith.addf %282, %286 : vector<64x32xf32>
    %288 = vector.shape_cast %287 : vector<64x32xf32> to vector<8x8x32xf32>
    %c0_88 = arith.constant 0 : index
    %c0_89 = arith.constant 0 : index
    %289 = vector.load %arg8[%c0_88, %c0_89] : memref<1x32xf32, #tpu.memory_space<vmem>>, vector<1x32xf32>
    %290 = vector.shape_cast %289 : vector<1x32xf32> to vector<1x1x32xf32>
    %291 = vector.broadcast %290 : vector<1x1x32xf32> to vector<8x8x32xf32>
    %292 = arith.addf %288, %291 : vector<8x8x32xf32>
    %293 = math.tanh %292 : vector<8x8x32xf32>
    %c0_90 = arith.constant 0 : index
    %c0_91 = arith.constant 0 : index
    %294 = vector.load %arg9[%c0_90, %c0_91] : memref<1x32xf32, #tpu.memory_space<vmem>>, vector<1x32xf32>
    %295 = vector.shape_cast %294 : vector<1x32xf32> to vector<1x1x32xf32>
    %296 = vector.broadcast %295 : vector<1x1x32xf32> to vector<8x8x32xf32>
    %297 = arith.mulf %293, %296 : vector<8x8x32xf32>
    %cst_92 = arith.constant dense<0.000000e+00> : vector<8x8xf32>
    %298 = vector.multi_reduction <add>, %297, %cst_92 [2] : vector<8x8x32xf32> to vector<8x8xf32>
    %299 = vector.shape_cast %298 : vector<8x8xf32> to vector<8x8x1xf32>
    %cst_93 = arith.constant dense<0xFF800000> : vector<8x1xf32>
    %300 = vector.multi_reduction <maximumf>, %299, %cst_93 [0] : vector<8x8x1xf32> to vector<8x1xf32>
    %301 = vector.shape_cast %300 : vector<8x1xf32> to vector<1x8x1xf32>
    %302 = vector.broadcast %301 : vector<1x8x1xf32> to vector<8x8x1xf32>
    %303 = arith.subf %299, %302 : vector<8x8x1xf32>
    %304 = math.exp %303 : vector<8x8x1xf32>
    %cst_94 = arith.constant dense<0.000000e+00> : vector<8x1xf32>
    %305 = vector.multi_reduction <add>, %304, %cst_94 [0] : vector<8x8x1xf32> to vector<8x1xf32>
    %306 = vector.shape_cast %305 : vector<8x1xf32> to vector<1x8x1xf32>
    %307 = vector.broadcast %306 : vector<1x8x1xf32> to vector<8x8x1xf32>
    %308 = arith.divf %304, %307 : vector<8x8x1xf32>
    %309 = vector.broadcast %308 : vector<8x8x1xf32> to vector<8x8x16xf32>
    %310 = arith.mulf %309, %277 : vector<8x8x16xf32>
    %cst_95 = arith.constant dense<0.000000e+00> : vector<8x16xf32>
    %311 = vector.multi_reduction <add>, %310, %cst_95 [0] : vector<8x8x16xf32> to vector<8x16xf32>
    %c0_96 = arith.constant 0 : index
    %c0_97 = arith.constant 0 : index
    %312 = vector.load %arg10[%c0_96, %c0_97] : memref<8x32xf32, #tpu.memory_space<vmem>>, vector<8x16xf32>
    tpu.vector_store %arg10[%c0_96, %c0_97], %311 {strides = array<i32>} : memref<8x32xf32, #tpu.memory_space<vmem>>, vector<8x16xf32>,
    %313 = vector.broadcast %308 : vector<8x8x1xf32> to vector<8x8x16xf32>
    %314 = arith.mulf %313, %278 : vector<8x8x16xf32>
    %cst_98 = arith.constant dense<0.000000e+00> : vector<8x16xf32>
    %315 = vector.multi_reduction <add>, %314, %cst_98 [0] : vector<8x8x16xf32> to vector<8x16xf32>
    %c0_99 = arith.constant 0 : index
    %c16 = arith.constant 16 : index
    %316 = vector.load %arg10[%c0_99, %c16] : memref<8x32xf32, #tpu.memory_space<vmem>>, vector<8x16xf32>
    tpu.vector_store %arg10[%c0_99, %c16], %315 {strides = array<i32>} : memref<8x32xf32, #tpu.memory_space<vmem>>, vector<8x16xf32>,
    return
  }
  func.func @transform_0(%arg0: i32) -> (i32, i32, i32) {
    %c0_i32 = arith.constant 0 : i32
    %c0_i32_0 = arith.constant 0 : i32
    %c0_i32_1 = arith.constant 0 : i32
    return %c0_i32, %arg0, %c0_i32_0 : i32, i32, i32
  }
  func.func @transform_1(%arg0: i32) -> (i32, i32) {
    %c0_i32 = arith.constant 0 : i32
    %c0_i32_0 = arith.constant 0 : i32
    %c0_i32_1 = arith.constant 0 : i32
    return %c0_i32, %c0_i32_0 : i32, i32
  }
  func.func @transform_2(%arg0: i32) -> (i32, i32) {
    %c0_i32 = arith.constant 0 : i32
    %c0_i32_0 = arith.constant 0 : i32
    %c0_i32_1 = arith.constant 0 : i32
    return %c0_i32, %c0_i32_0 : i32, i32
  }
  func.func @transform_3(%arg0: i32) -> (i32, i32) {
    %c0_i32 = arith.constant 0 : i32
    %c0_i32_0 = arith.constant 0 : i32
    %c0_i32_1 = arith.constant 0 : i32
    return %c0_i32, %c0_i32_0 : i32, i32
  }
  func.func @transform_4(%arg0: i32) -> (i32, i32) {
    %c0_i32 = arith.constant 0 : i32
    %c0_i32_0 = arith.constant 0 : i32
    %c0_i32_1 = arith.constant 0 : i32
    return %c0_i32, %c0_i32_0 : i32, i32
  }
  func.func @transform_5(%arg0: i32) -> (i32, i32) {
    %c0_i32 = arith.constant 0 : i32
    %c0_i32_0 = arith.constant 0 : i32
    %c0_i32_1 = arith.constant 0 : i32
    return %c0_i32, %c0_i32_0 : i32, i32
  }
  func.func @transform_6(%arg0: i32) -> (i32, i32) {
    %c0_i32 = arith.constant 0 : i32
    %c0_i32_0 = arith.constant 0 : i32
    %c0_i32_1 = arith.constant 0 : i32
    return %c0_i32, %c0_i32_0 : i32, i32
  }
  func.func @transform_7(%arg0: i32) -> (i32, i32) {
    %c0_i32 = arith.constant 0 : i32
    %c0_i32_0 = arith.constant 0 : i32
    %c0_i32_1 = arith.constant 0 : i32
    return %c0_i32, %c0_i32_0 : i32, i32
  }
  func.func @transform_8(%arg0: i32) -> (i32, i32) {
    %c0_i32 = arith.constant 0 : i32
    %c0_i32_0 = arith.constant 0 : i32
    %c0_i32_1 = arith.constant 0 : i32
    return %c0_i32, %c0_i32_0 : i32, i32
  }
  func.func @transform_9(%arg0: i32) -> (i32, i32) {
    %c0_i32 = arith.constant 0 : i32
    %c0_i32_0 = arith.constant 0 : i32
    return %arg0, %c0_i32 : i32, i32
  }
}

</mosaic_0001>

<bundles_post_ra>
// kernel: tpu_custom_call.1
= control target key start
LH: loop header
LB: loop body
LE: loop exit
PB: predicated region body
PF: predicated region fallthrough
CT: control target
= control target key end

     0   :  { %14 = vsyncpa [#allocation5], 0  ;;  %s1820_s0 = inlined_call_operand.hbm [shape: bf16[8,8,32], index: 0, kind: input, shape index: {}]   ;;  %s1821_s1 = inlined_call_operand.hbm [shape: bf16[32,96], index: 1, kind: input, shape index: {}]   ;;  %s1822_s2 = inlined_call_operand.vmem [shape: f32[1,96], index: 2, kind: input, shape index: {}]   ;;  %s1823_s3 = inlined_call_operand.hbm [shape: bf16[32,96], index: 3, kind: input, shape index: {}]   ;;  %s1824_s4 = inlined_call_operand.vmem [shape: f32[1,32], index: 4, kind: input, shape index: {}]   ;;  %s1825_s5 = inlined_call_operand.hbm [shape: bf16[16,32], index: 5, kind: input, shape index: {}]   ;;  %s1826_s6 = inlined_call_operand.hbm [shape: bf16[16,32], index: 6, kind: input, shape index: {}]   ;;  %s1827_s7 = inlined_call_operand.vmem [shape: f32[1,32], index: 7, kind: input, shape index: {}]   ;;  %s1828_s8 = inlined_call_operand.vmem [shape: f32[1,32], index: 8, kind: input, shape index: {}]   ;;  %s1829_s9 = inlined_call_operand.hbm [shape: f32[8,32], index: 9, kind: output, shape index: {}]  }
   0x1   :  { %15 = vsyncpa [#allocation8], 0 }
   0x2   :  { %16 = vsyncpa [#allocation11], 0 }
   0x3   :  { %17 = vsyncpa [#allocation6], 0  ;;  %s35_s11 = sshll.u32 %s1821_s1, 4  ;;  %s1425_s12 = smov [#allocation7]   ;;  %s36_s11 = int_to_ptr.hbm [resolvable:$true] %s35_s11 }
   0x4   :  { %s37_s13 = sshll.u32 %s1425_s12, 4  ;;  %s65_s16 = sshll.u32 %s1825_s5, 4  ;;  %s38_s13 = int_to_ptr.vmem [resolvable:$true] %s37_s13  ;;  %s66_s16 = int_to_ptr.hbm [resolvable:$true] %s65_s16 }
   0x5   :  { %s1426_s17 = smov 64   ;;  %s1427_s18 = smov 4  }
   0x6   :  { %43 = dma.hbm_to_vmem [thread:$0]  %s36_s11, 256, %s38_s13, [#allocation8], %s1426_s17, %s1426_s17, %s1427_s18  }
   0x7   :  { %s1428_s19 = smov [#allocation10]   ;;  %s22_s1 = sshll.u32 %s1820_s0, 4  ;;  %s23_s1 = int_to_ptr.hbm [resolvable:$true] %s22_s1 }
   0x8   :  { %s67_s20 = sshll.u32 %s1428_s19, 4  ;;  %s50_s5 = sshll.u32 %s1823_s3, 4  ;;  %s68_s20 = int_to_ptr.vmem [resolvable:$true] %s67_s20  ;;  %s51_s5 = int_to_ptr.hbm [resolvable:$true] %s50_s5 }
   0x9   :  { %73 = dma.hbm_to_vmem [thread:$0]  %s66_s16, 128, %s68_s20, [#allocation11], %s1426_s17, %s1426_s17, %s1427_s18  }
   0xa   :  { %s1429_s25 = smov [#allocation4]   ;;  %s1430_s27 = smov [#allocation9]  }
   0xb   :  { %s24_s26 = sshll.u32 %s1429_s25, 4  ;;  %s52_s28 = sshll.u32 %s1430_s27, 4  ;;  %s25_s26 = int_to_ptr.vmem [resolvable:$true] %s24_s26  ;;  %s53_s28 = int_to_ptr.vmem [resolvable:$true] %s52_s28 }
   0xc   :  { %30 = dma.hbm_to_vmem [thread:$0]  %s23_s1, 512, %s25_s26, [#allocation5], %s1426_s17, %s1426_s17, %s1427_s18  }
   0xd   :  { %s78_s30 = sshll.u32 %s1826_s6, 4  ;;  %s1431_s10 = smov [#allocation12]   ;;  %s79_s30 = int_to_ptr.hbm [resolvable:$true] %s78_s30 }
   0xe   :  { %58 = dma.hbm_to_vmem [thread:$0]  %s51_s5, 256, %s53_s28, [#allocation8], %s1426_s17, %s1426_s17, %s1427_s18  }
   0xf   :  { %s80_s3 = sshll.u32 %s1431_s10, 4  ;;  %s81_s3 = int_to_ptr.vmem [resolvable:$true] %s80_s3 }
  0x10   :  { %86 = dma.hbm_to_vmem [thread:$0]  %s79_s30, 128, %s81_s3, [#allocation11], %s1426_s17, %s1426_s17, %s1427_s18  }
  0x11   :  { %1417 = dma.done.wait [#allocation5], 512  }
  0x12   :  { %1418 = vsyncadd [#allocation5], 4294966784 }
  0x13   :  { %1419 = dma.done.wait [#allocation8], 512  }
  0x14   :  { %1420 = vsyncadd [#allocation8], 4294966784 }
  0x15   :  { %1421 = dma.done.wait [#allocation11], 256  }
  0x16   :  { %1422 = vsyncadd [#allocation11], 4294967040  ;;  %v1169_v0 = vld [vmem:[#allocation7 + $0x8] sm:$0xff]  ;;  %v1512_v1 = vld [vmem:[#allocation9 + $0x8] sm:$0xff]  ;;  %vm160_vm0 = vcmask 261120   ;;  %v1432_v6 = vmov 0  }
  0x17   :  { %v1168_v2 = vld [vmem:[#allocation7] sm:$0xff]  ;;  %v1514_v3 = vld [vmem:[#allocation9] sm:$0xff]  ;;  %179 = vmatpush.bf16.msra.mxu0 %v1169_v0  ;;  %230 = vmatpush.bf16.msra.mxu1 %v1512_v1  ;;  %v1165_v0 = vld [vmem:[#allocation4 + $0x8] sm:$0xff]  ;;  %s1434_s13 = smov 80   ;;  %s1085_s21 = sshll.u32 %s1829_s9, 4  ;;  %s1086_s21 = int_to_ptr.hbm [resolvable:$true] %s1085_s21 }
  0x18   :  { %v1187_v4 = vld [vmem:[%s1824_s4] ss:$0 sm:$0xff]  ;;  %304 = vmatpush.bf16.msra.mxu2 %v1512_v1  ;;  %588 = vmatpush.bf16.msra.mxu3 %v1512_v1 }
  0x19   :  { %257 = vrot.lane.b32.xlu0 %v1187_v4, %s1426_s17  ;;  %v1164_v5 = vld [vmem:[#allocation4] sm:$0xff] }
  0x1a   :  { %v1542_v11 = vld [vmem:[%s1822_s2] ss:$0 sm:$0xff]  ;;  %s1433_s2 = smov 96  }
  0x1b   :  { %180 = vmatpush.bf16.msra.mxu0 %v1168_v2  ;;  %231 = vmatpush.bf16.msra.mxu1 %v1514_v3 }
  0x1c   :  { %305 = vmatpush.bf16.msra.mxu2 %v1514_v3  ;;  %589 = vmatpush.bf16.msra.mxu3 %v1514_v3 }
  0x1e   :  { %1121 = vmatmul.msk.bf16.vlgmr.msra.gmra.mxu0 %vm160_vm0, %v1164_v5  ;;  %232 = vmatmul.bf16.vlgmr.msra.gmra.mxu1 %v1432_v6 }
  0x1f   :  { %375 = vmatpush.bf16.msrb.mxu0 %v1512_v1  ;;  %446 = vmatpush.bf16.msrb.mxu1 %v1512_v1 }
  0x20   :  { %517 = vmatpush.bf16.msrb.mxu2 %v1512_v1 }
  0x23   :  { %376 = vmatpush.bf16.msrb.mxu0 %v1514_v3  ;;  %447 = vmatpush.bf16.msrb.mxu1 %v1514_v3 }
  0x24   :  { %518 = vmatpush.bf16.msrb.mxu2 %v1514_v3 }
  0x27   :  { %659 = vmatpush.bf16.msra.mxu1 %v1512_v1 }
  0x2b   :  { %660 = vmatpush.bf16.msra.mxu1 %v1514_v3 }
  0x2e   :  { %1122 = vmatmul.msk.bf16.gmra.mxu0 %vm160_vm0, %v1165_v0 }
  0x8b   :  { %v1535_v7 = vpop.permute.xlu0 %257 }
  0x9b   :  { %v233_v8 = vpop.f32.mrf.mxu1  ;;  %v182_v12 = vpop.f32.mrf.mxu0 }
  0x9c   :  { %v260_v9 = vadd.f32 %v1535_v7, %v233_v8  ;;  %v183_v13 = vadd.f32 %v1542_v11, %v182_v12 }
  0x9e   :  { %262 = vrot.lane.b32.xlu0 %v260_v9, %s1426_s17  ;;  %v237_v14 = vadd.f32 %v233_v8, %v183_v13  ;;  %v1167_v9 = vld [vmem:[#allocation4 + $0x18] sm:$0xff] }
  0xa0   :  { %v1133_v15 = vmul.f32 -1.442695, %v237_v14 }
  0xa2   :  { %1191 = vpow2.f32 %v1133_v15 }
  0xa3   :  { %v235_v10 = vpop.f32.mrf.mxu1  ;;  %v184_v43 = vpop.f32.mrf.mxu0 }
  0xa4   :  { %v185_v44 = vadd.f32 %v1542_v11, %v184_v43 }
  0xa8   :  { %v1192_v16 = vpop.eup %1191 }
  0xa9   :  { %v241_v17 = vadd.f32 1.0, %v1192_v16 }
  0xab   :  { %1193 = vrcp.f32 %v241_v17  ;;  %v253_v23 = vand.u32 2147483648, %v241_v17  ;;  %vm247_vm2 = vweird.f32 %v241_v17  ;;  %v251_v24 = vand.u32 2147483647, %v241_v17  ;;  %v187_v12 = vpop.f32.mrf.mxu0 }
  0xad   :  { %v254_v26 = vor.u32 1.1754944e-38, %v253_v23  ;;  %vm252_vm4 = vcmp.eq.f32.partialorder %v251_v24, 8.507059e+37 }
  0xb1   :  { %v1194_v18 = vpop.eup %1193 }
  0xb2   :  { %v243_v19 = vmul.f32 %v1194_v18, %v241_v17  ;;  %vm248_vm1 = vweird.f32 %v1194_v18 }
  0xb3   :  { %vm249_vm3 = vmor %vm247_vm2, %vm248_vm1 }
  0xb4   :  { %v244_v20 = vsub.f32 1.0, %v243_v19 }
  0xb6   :  { %v245_v21 = vmul.f32 %v1194_v18, %v244_v20 }
  0xb8   :  { %v246_v22 = vadd.f32 %v1194_v18, %v245_v21  ;;  %v188_v21 = vadd.f32 %v1542_v11, %v187_v12 }
  0xba   :  { %v250_v25 = vsel %vm249_vm3, %v1194_v18, %v246_v22 }
  0xbb   :  { %v255_v28 = vsel %vm252_vm4, %v254_v26, %v250_v25 }
  0xbc   :  { %v272_v33 = vsub.f32 1.0, %v255_v28  ;;  %v278_v35 = vmul.f32 0.0, %v255_v28 }
 0x110   :  { %v263_v27 = vpop.permute.xlu0 %262 }
 0x111   :  { %v265_v29 = vmul.f32 %v263_v27, %v255_v28 }
 0x113   :  { %267 = vrot.lane.b32.xlu1 %v265_v29, %s1426_s17 }
 0x185   :  { %v268_v30 = vpop.permute.xlu1 %267 }
 0x186   :  { %v270_v31 = vadd.f32 %v268_v30, %v183_v13  ;;  %v189_v13 = vpop.f32.mrf.mxu0 }
 0x188   :  { %1195 = vtanh.f32 %v270_v31 }
 0x18e   :  { %v1196_v32 = vpop.eup %1195 }
 0x18f   :  { %274 = vrot.lane.b32.xlu1 %v1196_v32, %s1433_s2 }
 0x201   :  { %v275_v34 = vpop.permute.xlu1 %274 }
 0x202   :  { %v277_v36 = vmul.f32 %v275_v34, %v272_v33 }
 0x204   :  { %v1547_v37 = vadd.f32 %v278_v35, %v277_v36 }
 0x206   :  { %v291_v38 = vpack.c.bf16 %v1547_v37, %v1547_v37 }
 0x208   :  { %293 = vrot.lane.b32.xlu2 %v291_v38, %s1433_s2 }
 0x262   :  { %v294_v39 = vpop.permute.xlu2 %293 }
 0x263   :  { %1134 = vmatmul.msk.bf16.vlgmr.msra.gmra.mxu2 %vm160_vm0, %v294_v39 }
 0x264   :  { %730 = vmatpush.bf16.msra.mxu2 %v1512_v1  ;;  %v1166_v1 = vld [vmem:[#allocation4 + $0x10] sm:$0xff] }
 0x265   :  { %1123 = vmatmul.msk.bf16.gmra.mxu0 %vm160_vm0, %v1166_v1 }
 0x268   :  { %731 = vmatpush.bf16.msra.mxu2 %v1514_v3 }
 0x275   :  { %1124 = vmatmul.msk.bf16.gmra.mxu0 %vm160_vm0, %v1167_v9 }
 0x2e2   :  { %v1570_v14 = vpop.f32.mrf.mxu0 }
 0x2e6   :  { %v307_v40 = vpop.f32.mrf.mxu2 }
 0x2e7   :  { %v331_v41 = vadd.f32 %v307_v40, %v1535_v7  ;;  %v311_v45 = vadd.f32 %v307_v40, %v185_v44 }
 0x2e9   :  { %333 = vrot.lane.b32.xlu2 %v331_v41, %s1426_s17  ;;  %v1135_v46 = vmul.f32 -1.442695, %v311_v45 }
 0x2ea   :  { %v1572_v15 = vpop.f32.mrf.mxu0 }
 0x2eb   :  { %1197 = vpow2.f32 %v1135_v46 }
 0x2ee   :  { %v309_v42 = vpop.f32.mrf.mxu2 }
 0x2f1   :  { %v1198_v47 = vpop.eup %1197 }
 0x2f2   :  { %v315_v48 = vadd.f32 1.0, %v1198_v47  ;;  %v1574_v16 = vpop.f32.mrf.mxu0 }
 0x2f4   :  { %1199 = vrcp.f32 %v315_v48  ;;  %v327_v54 = vand.u32 2147483648, %v315_v48  ;;  %vm321_vm6 = vweird.f32 %v315_v48  ;;  %v325_v55 = vand.u32 2147483647, %v315_v48 }
 0x2f6   :  { %v328_v57 = vor.u32 1.1754944e-38, %v327_v54  ;;  %vm326_vm8 = vcmp.eq.f32.partialorder %v325_v55, 8.507059e+37 }
 0x2fa   :  { %v1200_v49 = vpop.eup %1199  ;;  %v1576_v17 = vpop.f32.mrf.mxu0 }
 0x2fb   :  { %v317_v50 = vmul.f32 %v1200_v49, %v315_v48  ;;  %vm322_vm5 = vweird.f32 %v1200_v49 }
 0x2fc   :  { %vm323_vm7 = vmor %vm321_vm6, %vm322_vm5 }
 0x2fd   :  { %v318_v51 = vsub.f32 1.0, %v317_v50 }
 0x2ff   :  { %v319_v52 = vmul.f32 %v1200_v49, %v318_v51 }
 0x301   :  { %v320_v53 = vadd.f32 %v1200_v49, %v319_v52  ;;  %v190_v52 = vadd.f32 %v1542_v11, %v189_v13 }
 0x303   :  { %v324_v56 = vsel %vm323_vm7, %v1200_v49, %v320_v53 }
 0x304   :  { %v329_v59 = vsel %vm326_vm8, %v328_v57, %v324_v56 }
 0x305   :  { %v343_v2 = vsub.f32 1.0, %v329_v59  ;;  %v349_v4 = vmul.f32 %v329_v59, %v1547_v37 }
 0x343   :  { %v334_v58 = vpop.permute.xlu2 %333 }
 0x344   :  { %v336_v60 = vmul.f32 %v334_v58, %v329_v59 }
 0x346   :  { %338 = vrot.lane.b32.xlu0 %v336_v60, %s1426_s17 }
 0x3b8   :  { %v339_v61 = vpop.permute.xlu0 %338 }
 0x3b9   :  { %v341_v62 = vadd.f32 %v339_v61, %v185_v44 }
 0x3bb   :  { %1201 = vtanh.f32 %v341_v62 }
 0x3c1   :  { %v1202_v63 = vpop.eup %1201 }
 0x3c2   :  { %345 = vrot.lane.b32.xlu1 %v1202_v63, %s1433_s2 }
 0x434   :  { %v346_v3 = vpop.permute.xlu1 %345 }
 0x435   :  { %v348_v5 = vmul.f32 %v346_v3, %v343_v2 }
 0x437   :  { %v1563_v6 = vadd.f32 %v349_v4, %v348_v5 }
 0x439   :  { %v362_v8 = vpack.c.bf16 %v1563_v6, %v1563_v6 }
 0x43b   :  { %364 = vrot.lane.b32.xlu2 %v362_v8, %s1433_s2 }
 0x495   :  { %v365_v10 = vpop.permute.xlu2 %364 }
 0x496   :  { %1136 = vmatmul.msk.bf16.vlgmr.msrb.gmra.mxu0 %vm160_vm0, %v365_v10 }
 0x513   :  { %v378_v18 = vpop.f32.mrf.mxu0 }
 0x514   :  { %v402_v19 = vadd.f32 %v378_v18, %v1535_v7  ;;  %v382_v22 = vadd.f32 %v378_v18, %v188_v21 }
 0x516   :  { %404 = vrot.lane.b32.xlu0 %v402_v19, %s1426_s17  ;;  %v1137_v23 = vmul.f32 -1.442695, %v382_v22 }
 0x518   :  { %1203 = vpow2.f32 %v1137_v23 }
 0x51b   :  { %v380_v20 = vpop.f32.mrf.mxu0 }
 0x51e   :  { %v1204_v24 = vpop.eup %1203 }
 0x51f   :  { %v386_v25 = vadd.f32 1.0, %v1204_v24 }
 0x521   :  { %1205 = vrcp.f32 %v386_v25  ;;  %v398_v31 = vand.u32 2147483648, %v386_v25  ;;  %vm392_vm10 = vweird.f32 %v386_v25  ;;  %v396_v32 = vand.u32 2147483647, %v386_v25 }
 0x523   :  { %v399_v34 = vor.u32 1.1754944e-38, %v398_v31  ;;  %vm397_vm12 = vcmp.eq.f32.partialorder %v396_v32, 8.507059e+37 }
 0x527   :  { %v1206_v26 = vpop.eup %1205 }
 0x528   :  { %v388_v27 = vmul.f32 %v1206_v26, %v386_v25  ;;  %vm393_vm9 = vweird.f32 %v1206_v26  ;;  %v193_v25 = vadd.f32 %v1542_v11, %v1570_v14 }
 0x529   :  { %vm394_vm11 = vmor %vm392_vm10, %vm393_vm9 }
 0x52a   :  { %v389_v28 = vsub.f32 1.0, %v388_v27 }
 0x52c   :  { %v390_v29 = vmul.f32 %v1206_v26, %v389_v28 }
 0x52e   :  { %v391_v30 = vadd.f32 %v1206_v26, %v390_v29 }
 0x530   :  { %v395_v33 = vsel %vm394_vm11, %v1206_v26, %v391_v30 }
 0x531   :  { %v400_v36 = vsel %vm397_vm12, %v399_v34, %v395_v33 }
 0x532   :  { %v414_v42 = vsub.f32 1.0, %v400_v36  ;;  %v420_v44 = vmul.f32 %v400_v36, %v1563_v6 }
 0x588   :  { %v405_v35 = vpop.permute.xlu0 %404 }
 0x589   :  { %v407_v38 = vmul.f32 %v405_v35, %v400_v36 }
 0x58b   :  { %409 = vrot.lane.b32.xlu1 %v407_v38, %s1426_s17 }
 0x5fd   :  { %v410_v39 = vpop.permute.xlu1 %409 }
 0x5fe   :  { %v412_v40 = vadd.f32 %v410_v39, %v188_v21 }
 0x600   :  { %1207 = vtanh.f32 %v412_v40 }
 0x606   :  { %v1208_v41 = vpop.eup %1207 }
 0x607   :  { %416 = vrot.lane.b32.xlu2 %v1208_v41, %s1433_s2 }
 0x661   :  { %v417_v43 = vpop.permute.xlu2 %416 }
 0x662   :  { %v419_v45 = vmul.f32 %v417_v43, %v414_v42 }
 0x664   :  { %v1584_v46 = vadd.f32 %v420_v44, %v419_v45 }
 0x666   :  { %v433_v47 = vpack.c.bf16 %v1584_v46, %v1584_v46 }
 0x668   :  { %435 = vrot.lane.b32.xlu0 %v433_v47, %s1433_s2 }
 0x6da   :  { %v436_v48 = vpop.permute.xlu0 %435 }
 0x6db   :  { %1138 = vmatmul.msk.bf16.vlgmr.msrb.gmra.mxu1 %vm160_vm0, %v436_v48 }
 0x758   :  { %v449_v49 = vpop.f32.mrf.mxu1 }
 0x759   :  { %v473_v50 = vadd.f32 %v449_v49, %v1535_v7  ;;  %v453_v53 = vadd.f32 %v449_v49, %v190_v52 }
 0x75b   :  { %475 = vrot.lane.b32.xlu1 %v473_v50, %s1426_s17  ;;  %v1139_v54 = vmul.f32 -1.442695, %v453_v53 }
 0x75d   :  { %1209 = vpow2.f32 %v1139_v54 }
 0x760   :  { %v451_v51 = vpop.f32.mrf.mxu1 }
 0x763   :  { %v1210_v55 = vpop.eup %1209 }
 0x764   :  { %v457_v56 = vadd.f32 1.0, %v1210_v55 }
 0x766   :  { %1211 = vrcp.f32 %v457_v56  ;;  %v469_v62 = vand.u32 2147483648, %v457_v56  ;;  %vm463_vm14 = vweird.f32 %v457_v56  ;;  %v467_v63 = vand.u32 2147483647, %v457_v56 }
 0x768   :  { %v470_v1 = vor.u32 1.1754944e-38, %v469_v62  ;;  %vm468_vm1 = vcmp.eq.f32.partialorder %v467_v63, 8.507059e+37 }
 0x76c   :  { %v1212_v57 = vpop.eup %1211 }
 0x76d   :  { %v459_v58 = vmul.f32 %v1212_v57, %v457_v56  ;;  %vm464_vm13 = vweird.f32 %v1212_v57  ;;  %v195_v56 = vadd.f32 %v1542_v11, %v1572_v15 }
 0x76e   :  { %vm465_vm15 = vmor %vm463_vm14, %vm464_vm13 }
 0x76f   :  { %v460_v59 = vsub.f32 1.0, %v459_v58 }
 0x771   :  { %v461_v60 = vmul.f32 %v1212_v57, %v460_v59 }
 0x773   :  { %v462_v61 = vadd.f32 %v1212_v57, %v461_v60 }
 0x775   :  { %v466_v0 = vsel %vm465_vm15, %v1212_v57, %v462_v61 }
 0x776   :  { %v471_v3 = vsel %vm468_vm1, %v470_v1, %v466_v0 }
 0x777   :  { %v485_v10 = vsub.f32 1.0, %v471_v3  ;;  %v491_v13 = vmul.f32 %v471_v3, %v1584_v46 }
 0x7cd   :  { %v476_v2 = vpop.permute.xlu1 %475 }
 0x7ce   :  { %v478_v4 = vmul.f32 %v476_v2, %v471_v3 }
 0x7d0   :  { %480 = vrot.lane.b32.xlu2 %v478_v4, %s1426_s17 }
 0x82a   :  { %v481_v5 = vpop.permute.xlu2 %480 }
 0x82b   :  { %v483_v8 = vadd.f32 %v481_v5, %v190_v52 }
 0x82d   :  { %1213 = vtanh.f32 %v483_v8 }
 0x833   :  { %v1214_v9 = vpop.eup %1213 }
 0x834   :  { %487 = vrot.lane.b32.xlu0 %v1214_v9, %s1433_s2 }
 0x8a6   :  { %v488_v12 = vpop.permute.xlu0 %487 }
 0x8a7   :  { %v490_v18 = vmul.f32 %v488_v12, %v485_v10 }
 0x8a9   :  { %v1596_v19 = vadd.f32 %v491_v13, %v490_v18 }
 0x8ab   :  { %v504_v20 = vpack.c.bf16 %v1596_v19, %v1596_v19 }
 0x8ad   :  { %506 = vrot.lane.b32.xlu1 %v504_v20, %s1433_s2 }
 0x91f   :  { %v507_v21 = vpop.permute.xlu1 %506 }
 0x920   :  { %1140 = vmatmul.msk.bf16.vlgmr.msrb.gmra.mxu2 %vm160_vm0, %v507_v21 }
 0x9a3   :  { %v520_v22 = vpop.f32.mrf.mxu2 }
 0x9a4   :  { %v544_v23 = vadd.f32 %v520_v22, %v1535_v7  ;;  %v524_v26 = vadd.f32 %v520_v22, %v193_v25 }
 0x9a6   :  { %546 = vrot.lane.b32.xlu2 %v544_v23, %s1426_s17  ;;  %v1141_v27 = vmul.f32 -1.442695, %v524_v26 }
 0x9a8   :  { %1215 = vpow2.f32 %v1141_v27 }
 0x9ab   :  { %v522_v24 = vpop.f32.mrf.mxu2 }
 0x9ae   :  { %v1216_v28 = vpop.eup %1215 }
 0x9af   :  { %v528_v29 = vadd.f32 1.0, %v1216_v28 }
 0x9b1   :  { %1217 = vrcp.f32 %v528_v29  ;;  %v540_v35 = vand.u32 2147483648, %v528_v29  ;;  %vm534_vm3 = vweird.f32 %v528_v29  ;;  %v538_v36 = vand.u32 2147483647, %v528_v29 }
 0x9b3   :  { %v541_v39 = vor.u32 1.1754944e-38, %v540_v35  ;;  %vm539_vm5 = vcmp.eq.f32.partialorder %v538_v36, 8.507059e+37 }
 0x9b7   :  { %v1218_v30 = vpop.eup %1217 }
 0x9b8   :  { %v530_v31 = vmul.f32 %v1218_v30, %v528_v29  ;;  %vm535_vm2 = vweird.f32 %v1218_v30  ;;  %v198_v29 = vadd.f32 %v1542_v11, %v1574_v16 }
 0x9b9   :  { %vm536_vm4 = vmor %vm534_vm3, %vm535_vm2  ;;  %vm284_vm3 = vcmask 130048  }
 0x9ba   :  { %v531_v32 = vsub.f32 1.0, %v530_v31 }
 0x9bc   :  { %v532_v33 = vmul.f32 %v1218_v30, %v531_v32 }
 0x9be   :  { %v533_v34 = vadd.f32 %v1218_v30, %v532_v33 }
 0x9c0   :  { %v537_v38 = vsel %vm536_vm4, %v1218_v30, %v533_v34 }
 0x9c1   :  { %v542_v40 = vsel %vm539_vm5, %v541_v39, %v537_v38 }
 0x9c2   :  { %v556_v45 = vsub.f32 1.0, %v542_v40  ;;  %v562_v48 = vmul.f32 %v542_v40, %v1596_v19 }
 0xa00   :  { %v547_v14 = vpop.permute.xlu2 %546 }
 0xa01   :  { %v549_v41 = vmul.f32 %v547_v14, %v542_v40 }
 0xa03   :  { %551 = vrot.lane.b32.xlu0 %v549_v41, %s1426_s17 }
 0xa75   :  { %v552_v42 = vpop.permute.xlu0 %551 }
 0xa76   :  { %v554_v43 = vadd.f32 %v552_v42, %v193_v25 }
 0xa78   :  { %1219 = vtanh.f32 %v554_v43 }
 0xa7e   :  { %v1220_v44 = vpop.eup %1219 }
 0xa7f   :  { %558 = vrot.lane.b32.xlu1 %v1220_v44, %s1433_s2 }
 0xaf1   :  { %v559_v47 = vpop.permute.xlu1 %558 }
 0xaf2   :  { %v561_v49 = vmul.f32 %v559_v47, %v556_v45 }
 0xaf4   :  { %v1609_v50 = vadd.f32 %v562_v48, %v561_v49 }
 0xaf6   :  { %v575_v51 = vpack.c.bf16 %v1609_v50, %v1609_v50 }
 0xaf8   :  { %577 = vrot.lane.b32.xlu2 %v575_v51, %s1433_s2 }
 0xb52   :  { %v578_v52 = vpop.permute.xlu2 %577 }
 0xb53   :  { %1142 = vmatmul.msk.bf16.vlgmr.msra.gmra.mxu3 %vm160_vm0, %v578_v52 }
 0xbd6   :  { %v591_v53 = vpop.f32.mrf.mxu3 }
 0xbd7   :  { %v615_v54 = vadd.f32 %v591_v53, %v1535_v7  ;;  %v595_v57 = vadd.f32 %v591_v53, %v195_v56 }
 0xbd9   :  { %617 = vrot.lane.b32.xlu0 %v615_v54, %s1426_s17  ;;  %v1143_v58 = vmul.f32 -1.442695, %v595_v57 }
 0xbdb   :  { %1221 = vpow2.f32 %v1143_v58 }
 0xbde   :  { %v593_v55 = vpop.f32.mrf.mxu3 }
 0xbe1   :  { %v1222_v59 = vpop.eup %1221 }
 0xbe2   :  { %v599_v60 = vadd.f32 1.0, %v1222_v59 }
 0xbe4   :  { %1223 = vrcp.f32 %v599_v60  ;;  %v611_v2 = vand.u32 2147483648, %v599_v60  ;;  %vm605_vm7 = vweird.f32 %v599_v60  ;;  %v609_v3 = vand.u32 2147483647, %v599_v60 }
 0xbe6   :  { %v612_v5 = vor.u32 1.1754944e-38, %v611_v2  ;;  %vm610_vm9 = vcmp.eq.f32.partialorder %v609_v3, 8.507059e+37 }
 0xbea   :  { %v1224_v61 = vpop.eup %1223 }
 0xbeb   :  { %v601_v62 = vmul.f32 %v1224_v61, %v599_v60  ;;  %vm606_vm6 = vweird.f32 %v1224_v61  ;;  %v200_v60 = vadd.f32 %v1542_v11, %v1576_v17 }
 0xbec   :  { %vm607_vm8 = vmor %vm605_vm7, %vm606_vm6  ;;  %vm1076_vm7 = vcmask 261248  }
 0xbed   :  { %v602_v63 = vsub.f32 1.0, %v601_v62 }
 0xbef   :  { %v603_v0 = vmul.f32 %v1224_v61, %v602_v63 }
 0xbf1   :  { %v604_v1 = vadd.f32 %v1224_v61, %v603_v0 }
 0xbf3   :  { %v608_v4 = vsel %vm607_vm8, %v1224_v61, %v604_v1 }
 0xbf4   :  { %v613_v8 = vsel %vm610_vm9, %v612_v5, %v608_v4 }
 0xbf5   :  { %v627_v18 = vsub.f32 1.0, %v613_v8  ;;  %v633_v21 = vmul.f32 %v613_v8, %v1609_v50 }
 0xc4b   :  { %v618_v15 = vpop.permute.xlu0 %617 }
 0xc4c   :  { %v620_v9 = vmul.f32 %v618_v15, %v613_v8 }
 0xc4e   :  { %622 = vrot.lane.b32.xlu1 %v620_v9, %s1426_s17 }
 0xcc0   :  { %v623_v10 = vpop.permute.xlu1 %622 }
 0xcc1   :  { %v625_v12 = vadd.f32 %v623_v10, %v195_v56 }
 0xcc3   :  { %1225 = vtanh.f32 %v625_v12 }
 0xcc9   :  { %v1226_v13 = vpop.eup %1225 }
 0xcca   :  { %629 = vrot.lane.b32.xlu2 %v1226_v13, %s1433_s2 }
 0xd24   :  { %v630_v20 = vpop.permute.xlu2 %629 }
 0xd25   :  { %v632_v22 = vmul.f32 %v630_v20, %v627_v18 }
 0xd27   :  { %v1622_v23 = vadd.f32 %v633_v21, %v632_v22 }
 0xd29   :  { %v646_v24 = vpack.c.bf16 %v1622_v23, %v1622_v23 }
 0xd2b   :  { %648 = vrot.lane.b32.xlu0 %v646_v24, %s1433_s2 }
 0xd9d   :  { %v649_v25 = vpop.permute.xlu0 %648 }
 0xd9e   :  { %1144 = vmatmul.msk.bf16.vlgmr.msra.gmra.mxu1 %vm160_vm0, %v649_v25 }
 0xe1b   :  { %v662_v26 = vpop.f32.mrf.mxu1 }
 0xe1c   :  { %v686_v27 = vadd.f32 %v662_v26, %v1535_v7  ;;  %v666_v30 = vadd.f32 %v662_v26, %v198_v29 }
 0xe1e   :  { %688 = vrot.lane.b32.xlu1 %v686_v27, %s1426_s17  ;;  %v1145_v31 = vmul.f32 -1.442695, %v666_v30  ;;  %v1172_v27 = vld [vmem:[#allocation10] sm:$0xff] }
 0xe1f   :  { %887 = vmatpush.bf16.msrb.mxu1 %v1172_v27  ;;  %1174 = vmatpush.bf16.msrb.mxu2 %v1172_v27 }
 0xe20   :  { %1227 = vpow2.f32 %v1145_v31 }
 0xe23   :  { %v664_v28 = vpop.f32.mrf.mxu1 }
 0xe26   :  { %v1228_v32 = vpop.eup %1227 }
 0xe27   :  { %v670_v33 = vadd.f32 1.0, %v1228_v32  ;;  %v1173_v32 = vld [vmem:[#allocation12] sm:$0xff] }
 0xe28   :  { %840 = vmatpush.bf16.msrb.mxu3 %v1173_v32 }
 0xe29   :  { %1229 = vrcp.f32 %v670_v33  ;;  %v682_v14 = vand.u32 2147483648, %v670_v33  ;;  %vm676_vm11 = vweird.f32 %v670_v33  ;;  %v680_v40 = vand.u32 2147483647, %v670_v33 }
 0xe2b   :  { %v683_v42 = vor.u32 1.1754944e-38, %v682_v14  ;;  %vm681_vm13 = vcmp.eq.f32.partialorder %v680_v40, 8.507059e+37 }
 0xe2f   :  { %v1230_v34 = vpop.eup %1229 }
 0xe30   :  { %v672_v35 = vmul.f32 %v1230_v34, %v670_v33  ;;  %vm677_vm10 = vweird.f32 %v1230_v34 }
 0xe31   :  { %vm678_vm12 = vmor %vm676_vm11, %vm677_vm10 }
 0xe32   :  { %v673_v36 = vsub.f32 1.0, %v672_v35 }
 0xe34   :  { %v674_v38 = vmul.f32 %v1230_v34, %v673_v36 }
 0xe36   :  { %v675_v39 = vadd.f32 %v1230_v34, %v674_v38 }
 0xe38   :  { %v679_v41 = vsel %vm678_vm12, %v1230_v34, %v675_v39 }
 0xe39   :  { %v684_v43 = vsel %vm681_vm13, %v683_v42, %v679_v41 }
 0xe3a   :  { %v698_v49 = vsub.f32 1.0, %v684_v43  ;;  %v704_v52 = vmul.f32 %v684_v43, %v1622_v23 }
 0xe90   :  { %v689_v16 = vpop.permute.xlu1 %688 }
 0xe91   :  { %v691_v44 = vmul.f32 %v689_v16, %v684_v43 }
 0xe93   :  { %693 = vrot.lane.b32.xlu2 %v691_v44, %s1426_s17 }
 0xeed   :  { %v694_v45 = vpop.permute.xlu2 %693 }
 0xeee   :  { %v696_v47 = vadd.f32 %v694_v45, %v198_v29 }
 0xef0   :  { %1231 = vtanh.f32 %v696_v47 }
 0xef6   :  { %v1232_v48 = vpop.eup %1231 }
 0xef7   :  { %700 = vrot.lane.b32.xlu0 %v1232_v48, %s1433_s2 }
 0xf69   :  { %v701_v51 = vpop.permute.xlu0 %700 }
 0xf6a   :  { %v703_v53 = vmul.f32 %v701_v51, %v698_v49 }
 0xf6c   :  { %v1635_v54 = vadd.f32 %v704_v52, %v703_v53 }
 0xf6e   :  { %v717_v55 = vpack.c.bf16 %v1635_v54, %v1635_v54 }
 0xf70   :  { %719 = vrot.lane.b32.xlu1 %v717_v55, %s1433_s2 }
 0xfe2   :  { %v720_v56 = vpop.permute.xlu1 %719 }
 0xfe3   :  { %1146 = vmatmul.msk.bf16.vlgmr.msra.gmra.mxu2 %vm160_vm0, %v720_v56 }
0x1066   :  { %v733_v57 = vpop.f32.mrf.mxu2 }
0x1067   :  { %v757_v58 = vadd.f32 %v733_v57, %v1535_v7  ;;  %v737_v7 = vadd.f32 %v733_v57, %v200_v60 }
0x1069   :  { %759 = vrot.lane.b32.xlu2 %v757_v58, %s1426_s17  ;;  %v1147_v61 = vmul.f32 -1.442695, %v737_v7 }
0x106b   :  { %1233 = vpow2.f32 %v1147_v61 }
0x106e   :  { %v735_v59 = vpop.f32.mrf.mxu2 }
0x1071   :  { %712 = vrot.lane.b32.xlu2 %v1635_v54, %s1434_s13  ;;  %v1234_v62 = vpop.eup %1233 }
0x1072   :  { %v741_v63 = vadd.f32 1.0, %v1234_v62 }
0x1074   :  { %1235 = vrcp.f32 %v741_v63  ;;  %v753_v5 = vand.u32 2147483648, %v741_v63  ;;  %vm747_vm15 = vweird.f32 %v741_v63  ;;  %v751_v11 = vand.u32 2147483647, %v741_v63 }
0x1076   :  { %v754_v15 = vor.u32 1.1754944e-38, %v753_v5  ;;  %vm752_vm2 = vcmp.eq.f32.partialorder %v751_v11, 8.507059e+37  ;;  %v1759_v5 = vld [vmem:[%s1828_s8] ss:$0 sm:$0xff]  ;;  %s1436_s8 = smov [#allocation13]  }
0x1077   :  { %s1083_s18 = sshll.u32 %s1436_s8, 4  ;;  %s1084_s18 = int_to_ptr.vmem [resolvable:$true] %s1083_s18 }
0x1079   :  { %641 = vrot.lane.b32.xlu2 %v1622_v23, %s1434_s13 }
0x107a   :  { %v1236_v0 = vpop.eup %1235 }
0x107b   :  { %v743_v1 = vmul.f32 %v1236_v0, %v741_v63  ;;  %vm748_vm14 = vweird.f32 %v1236_v0  ;;  %v1753_v63 = vld [vmem:[%s1827_s7] ss:$0 sm:$0xff]  ;;  %s1435_s7 = smov 16  }
0x107c   :  { %vm749_vm1 = vmor %vm747_vm15, %vm748_vm14 }
0x107d   :  { %v744_v2 = vsub.f32 1.0, %v743_v1 }
0x107f   :  { %v745_v3 = vmul.f32 %v1236_v0, %v744_v2 }
0x1081   :  { %565 = vrot.lane.b32.xlu2 %v1609_v50, %s1433_s2  ;;  %v746_v4 = vadd.f32 %v1236_v0, %v745_v3 }
0x1083   :  { %v750_v17 = vsel %vm749_vm1, %v1236_v0, %v746_v4 }
0x1084   :  { %v755_v9 = vsel %vm752_vm2, %v754_v15, %v750_v17 }
0x1085   :  { %v769_v28 = vsub.f32 1.0, %v755_v9  ;;  %v775_v30 = vmul.f32 %v755_v9, %v1635_v54 }
0x1089   :  { %352 = vrot.lane.b32.xlu2 %v1563_v6, %s1433_s2 }
0x1091   :  { %707 = vrot.lane.b32.xlu2 %v1635_v54, %s1433_s2 }
0x1099   :  { %494 = vrot.lane.b32.xlu2 %v1596_v19, %s1433_s2 }
0x10c3   :  { %v760_v8 = vpop.permute.xlu2 %759 }
0x10c4   :  { %v762_v10 = vmul.f32 %v760_v8, %v755_v9 }
0x10c6   :  { %764 = vrot.lane.b32.xlu0 %v762_v10, %s1426_s17 }
0x10cb   :  { %v713_v12 = vpop.permute.xlu2 %712 }
0x10cc   :  { %716 = vst.msk [vmem:[#allocation3 + $0x8] sm:$0xff] %vm284_vm3, %v713_v12 }
0x10d3   :  { %v642_v13 = vpop.permute.xlu2 %641  ;;  %v1706_v42 = vld [vmem:[#allocation3 + $0x8] sm:$0xff] }
0x10d4   :  { %645 = vst.msk [vmem:[#allocation3 + $0x10] sm:$0xff] %vm284_vm3, %v642_v13 }
0x10db   :  { %v566_v18 = vpop.permute.xlu2 %565  ;;  %v1715_v47 = vld [vmem:[#allocation3 + $0x10] sm:$0xff] }
0x10dc   :  { %569 = vst.msk [vmem:[#allocation2 + $0x20] sm:$0xff] %vm284_vm3, %v566_v18 }
0x10e3   :  { %v353_v20 = vpop.permute.xlu2 %352  ;;  %v1717_v48 = vld [vmem:[#allocation2 + $0x20] sm:$0xff] }
0x10e4   :  { %356 = vst.msk [vmem:[#allocation2 + $0x8] sm:$0xff] %vm284_vm3, %v353_v20 }
0x10eb   :  { %v708_v21 = vpop.permute.xlu2 %707  ;;  %v1688_v36 = vld [vmem:[#allocation2 + $0x8] sm:$0xff] }
0x10ec   :  { %711 = vst.msk [vmem:[#allocation2 + $0x30] sm:$0xff] %vm284_vm3, %v708_v21 }
0x10f3   :  { %v495_v22 = vpop.permute.xlu2 %494  ;;  %v1733_v56 = vld [vmem:[#allocation2 + $0x30] sm:$0xff] }
0x10f4   :  { %498 = vst.msk [vmem:[#allocation2 + $0x18] sm:$0xff] %vm284_vm3, %v495_v22 }
0x1138   :  { %v765_v24 = vpop.permute.xlu0 %764 }
0x1139   :  { %v767_v25 = vadd.f32 %v765_v24, %v200_v60 }
0x113b   :  { %1237 = vtanh.f32 %v767_v25 }
0x1141   :  { %v1238_v26 = vpop.eup %1237 }
0x1142   :  { %771 = vrot.lane.b32.xlu1 %v1238_v26, %s1433_s2 }
0x114a   :  { %570 = vrot.lane.b32.xlu1 %v1609_v50, %s1434_s13 }
0x1152   :  { %499 = vrot.lane.b32.xlu1 %v1596_v19, %s1434_s13 }
0x115a   :  { %281 = vrot.lane.b32.xlu1 %v1547_v37, %s1433_s2 }
0x1162   :  { %357 = vrot.lane.b32.xlu1 %v1563_v6, %s1434_s13 }
0x116a   :  { %423 = vrot.lane.b32.xlu1 %v1584_v46, %s1433_s2 }
0x11b4   :  { %v772_v29 = vpop.permute.xlu1 %771 }
0x11b5   :  { %v774_v50 = vmul.f32 %v772_v29, %v769_v28 }
0x11b7   :  { %v776_v31 = vadd.f32 %v775_v30, %v774_v50 }
0x11b9   :  { %783 = vrot.lane.b32.xlu0 %v776_v31, %s1434_s13 }
0x11bc   :  { %v571_v19 = vpop.permute.xlu1 %570 }
0x11bd   :  { %574 = vst.msk [vmem:[#allocation3 + $0x18] sm:$0xff] %vm284_vm3, %v571_v19 }
0x11c1   :  { %428 = vrot.lane.b32.xlu0 %v1584_v46, %s1434_s13 }
0x11c4   :  { %v500_v6 = vpop.permute.xlu1 %499  ;;  %v1713_v44 = vld [vmem:[#allocation3 + $0x18] sm:$0xff] }
0x11c5   :  { %503 = vst.msk [vmem:[#allocation3 + $0x20] sm:$0xff] %vm284_vm3, %v500_v6  ;;  %v810_v51 = vpack.c.bf16 %v1713_v44, %v1715_v47 }
0x11c9   :  { %636 = vrot.lane.b32.xlu0 %v1622_v23, %s1433_s2 }
0x11cc   :  { %v282_v33 = vpop.permute.xlu1 %281  ;;  %v1731_v55 = vld [vmem:[#allocation3 + $0x20] sm:$0xff] }
0x11cd   :  { %285 = vst.msk [vmem:[#allocation2] sm:$0xff] %vm284_vm3, %v282_v33 }
0x11d1   :  { %286 = vrot.lane.b32.xlu0 %v1547_v37, %s1434_s13  ;;  %v1698_v37 = vld [vmem:[#allocation2 + $0x18] sm:$0xff] }
0x11d4   :  { %v358_v34 = vpop.permute.xlu1 %357  ;;  %v1686_v35 = vld [vmem:[#allocation2] sm:$0xff] }
0x11d5   :  { %361 = vst.msk [vmem:[#allocation3 + $0x30] sm:$0xff] %vm284_vm3, %v358_v34  ;;  %v803_v46 = vpack.c.bf16 %v1688_v36, %v1686_v35 }
0x11d7   :  { %1160 = vmatmul.msk.bf16.vlgmr.msrb.gmra.mxu1 %vm284_vm3, %v803_v46 }
0x11d9   :  { %778 = vrot.lane.b32.xlu0 %v776_v31, %s1433_s2 }
0x11dc   :  { %v424_v23 = vpop.permute.xlu1 %423  ;;  %v1745_v7 = vld [vmem:[#allocation3 + $0x30] sm:$0xff] }
0x11dd   :  { %427 = vst.msk [vmem:[#allocation2 + $0x10] sm:$0xff] %vm284_vm3, %v424_v23 }
0x11e4   :  { %v1696_v38 = vld [vmem:[#allocation2 + $0x10] sm:$0xff] }
0x11e5   :  { %v804_v39 = vpack.c.bf16 %v1698_v37, %v1696_v38 }
0x11e7   :  { %1161 = vmatmul.msk.bf16.gmra.mxu1 %vm284_vm3, %v804_v39 }
0x122b   :  { %v784_v14 = vpop.permute.xlu0 %783 }
0x122c   :  { %786 = vst.msk [vmem:[#allocation3] sm:$0xff] %vm284_vm3, %v784_v14 }
0x1233   :  { %v429_v40 = vpop.permute.xlu0 %428  ;;  %v1704_v41 = vld [vmem:[#allocation3] sm:$0xff] }
0x1234   :  { %432 = vst.msk [vmem:[#allocation3 + $0x28] sm:$0xff] %vm284_vm3, %v429_v40  ;;  %v809_v16 = vpack.c.bf16 %v1706_v42, %v1704_v41 }
0x1236   :  { %1152 = vmatmul.msk.bf16.vlgmr.msrb.gmra.mxu3 %vm284_vm3, %v809_v16 }
0x123b   :  { %v637_v43 = vpop.permute.xlu0 %636  ;;  %v1729_v54 = vld [vmem:[#allocation3 + $0x28] sm:$0xff] }
0x123c   :  { %640 = vst.msk [vmem:[#allocation2 + $0x28] sm:$0xff] %vm284_vm3, %v637_v43  ;;  %v811_v58 = vpack.c.bf16 %v1729_v54, %v1731_v55 }
0x1243   :  { %v287_v45 = vpop.permute.xlu0 %286  ;;  %v1719_v49 = vld [vmem:[#allocation2 + $0x28] sm:$0xff] }
0x1244   :  { %290 = vst.msk [vmem:[#allocation3 + $0x38] sm:$0xff] %vm284_vm3, %v287_v45  ;;  %v805_v52 = vpack.c.bf16 %v1719_v49, %v1717_v48 }
0x1246   :  { %1153 = vmatmul.msk.bf16.gmra.mxu3 %vm284_vm3, %v810_v51  ;;  %1162 = vmatmul.msk.bf16.vlgmr.msrb.gmra.mxu2 %vm284_vm3, %v805_v52 }
0x124b   :  { %v779_v53 = vpop.permute.xlu0 %778  ;;  %v1743_v60 = vld [vmem:[#allocation3 + $0x38] sm:$0xff] }
0x124c   :  { %782 = vst.msk [vmem:[#allocation2 + $0x38] sm:$0xff] %vm284_vm3, %v779_v53  ;;  %v812_v61 = vpack.c.bf16 %v1743_v60, %v1745_v7 }
0x1253   :  { %v1735_v57 = vld [vmem:[#allocation2 + $0x38] sm:$0xff] }
0x1254   :  { %v806_v59 = vpack.c.bf16 %v1735_v57, %v1733_v56  ;;  %v889_v62 = vpop.f32.mrf.mxu1 }
0x1256   :  { %1154 = vmatmul.msk.bf16.gmra.mxu3 %vm284_vm3, %v811_v58  ;;  %1163 = vmatmul.msk.bf16.gmra.mxu2 %vm284_vm3, %v806_v59 }
0x125c   :  { %v891_v3 = vpop.f32.mrf.mxu1 }
0x1264   :  { %v894_v9 = vpop.f32.mrf.mxu1 }
0x1266   :  { %1155 = vmatmul.msk.bf16.gmra.mxu3 %vm284_vm3, %v812_v61 }
0x126c   :  { %v896_v24 = vpop.f32.mrf.mxu1 }
0x12b9   :  { %v842_v0 = vpop.f32.mrf.mxu3 }
0x12ba   :  { %v890_v1 = vadd.f32 %v889_v62, %v842_v0 }
0x12bc   :  { %v913_v2 = vadd.f32 %v1753_v63, %v890_v1 }
0x12be   :  { %1239 = vtanh.f32 %v913_v2 }
0x12c1   :  { %v844_v4 = vpop.f32.mrf.mxu3 }
0x12c2   :  { %v892_v11 = vadd.f32 %v891_v3, %v844_v4 }
0x12c4   :  { %v1240_v17 = vpop.eup %1239  ;;  %v914_v15 = vadd.f32 %v1753_v63, %v892_v11 }
0x12c5   :  { %v933_v8 = vmul.f32 %v1240_v17, %v1759_v5 }
0x12c6   :  { %1241 = vtanh.f32 %v914_v15 }
0x12c7   :  { %v941_v10 = vsel %vm160_vm0, %v933_v8, 0.0 }
0x12c8   :  { %942 = vadd.xlane.f32.xlu0 %v941_v10 }
0x12c9   :  { %v847_v12 = vpop.f32.mrf.mxu3  ;;  %v899_v27 = vpop.f32.mrf.mxu2 }
0x12ca   :  { %v895_v13 = vadd.f32 %v894_v9, %v847_v12 }
0x12cc   :  { %v1242_v18 = vpop.eup %1241  ;;  %v915_v20 = vadd.f32 %v1753_v63, %v895_v13 }
0x12cd   :  { %v934_v21 = vmul.f32 %v1242_v18, %v1759_v5 }
0x12ce   :  { %1243 = vtanh.f32 %v915_v20 }
0x12cf   :  { %v944_v22 = vsel %vm160_vm0, %v934_v21, 0.0 }
0x12d0   :  { %945 = vadd.xlane.f32.xlu1 %v944_v22 }
0x12d1   :  { %v849_v25 = vpop.f32.mrf.mxu3  ;;  %v901_v33 = vpop.f32.mrf.mxu2 }
0x12d2   :  { %v897_v26 = vadd.f32 %v896_v24, %v849_v25 }
0x12d4   :  { %v1244_v28 = vpop.eup %1243  ;;  %v916_v29 = vadd.f32 %v1753_v63, %v897_v26 }
0x12d5   :  { %v935_v30 = vmul.f32 %v1244_v28, %v1759_v5 }
0x12d6   :  { %1245 = vtanh.f32 %v916_v29 }
0x12d7   :  { %v947_v50 = vsel %vm160_vm0, %v935_v30, 0.0 }
0x12d8   :  { %948 = vadd.xlane.f32.xlu2 %v947_v50 }
0x12d9   :  { %v852_v31 = vpop.f32.mrf.mxu3  ;;  %v904_v43 = vpop.f32.mrf.mxu2 }
0x12da   :  { %v900_v19 = vadd.f32 %v899_v27, %v852_v31 }
0x12dc   :  { %v1246_v6 = vpop.eup %1245  ;;  %v917_v32 = vadd.f32 %v1753_v63, %v900_v19 }
0x12dd   :  { %v936_v34 = vmul.f32 %v1246_v6, %v1759_v5 }
0x12de   :  { %1247 = vtanh.f32 %v917_v32 }
0x12df   :  { %v950_v46 = vsel %vm160_vm0, %v936_v34, 0.0 }
0x12e0   :  { %951 = vadd.xlane.f32.xlu2 %v950_v46 }
0x12e1   :  { %v854_v23 = vpop.f32.mrf.mxu3  ;;  %v906_v62 = vpop.f32.mrf.mxu2 }
0x12e2   :  { %v902_v39 = vadd.f32 %v901_v33, %v854_v23 }
0x12e4   :  { %v1248_v14 = vpop.eup %1247  ;;  %v918_v40 = vadd.f32 %v1753_v63, %v902_v39 }
0x12e5   :  { %v937_v16 = vmul.f32 %v1248_v14, %v1759_v5 }
0x12e6   :  { %1249 = vtanh.f32 %v918_v40 }
0x12e7   :  { %v953_v45 = vsel %vm160_vm0, %v937_v16, 0.0 }
0x12e8   :  { %954 = vadd.xlane.f32.xlu0 %v953_v45 }
0x12e9   :  { %v857_v51 = vpop.f32.mrf.mxu3 }
0x12ea   :  { %v905_v52 = vadd.f32 %v904_v43, %v857_v51 }
0x12ec   :  { %v1250_v53 = vpop.eup %1249  ;;  %v919_v58 = vadd.f32 %v1753_v63, %v905_v52 }
0x12ed   :  { %v938_v59 = vmul.f32 %v1250_v53, %v1759_v5 }
0x12ee   :  { %1251 = vtanh.f32 %v919_v58 }
0x12ef   :  { %v956_v61 = vsel %vm160_vm0, %v938_v59, 0.0 }
0x12f0   :  { %957 = vadd.xlane.f32.xlu1 %v956_v61 }
0x12f1   :  { %v859_v0 = vpop.f32.mrf.mxu3 }
0x12f2   :  { %v907_v1 = vadd.f32 %v906_v62, %v859_v0 }
0x12f4   :  { %v1252_v2 = vpop.eup %1251  ;;  %v920_v3 = vadd.f32 %v1753_v63, %v907_v1 }
0x12f5   :  { %v939_v4 = vmul.f32 %v1252_v2, %v1759_v5 }
0x12f6   :  { %1253 = vtanh.f32 %v920_v3 }
0x12f7   :  { %v959_v11 = vsel %vm160_vm0, %v939_v4, 0.0 }
0x12f8   :  { %960 = vadd.xlane.f32.xlu2 %v959_v11 }
0x12fc   :  { %v1254_v17 = vpop.eup %1253 }
0x12fd   :  { %v940_v15 = vmul.f32 %v1254_v17, %v1759_v5 }
0x12ff   :  { %v962_v8 = vsel %vm160_vm0, %v940_v15, 0.0 }
0x1300   :  { %963 = vadd.xlane.f32.xlu0 %v962_v8 }
0x133b   :  { %v943_v10 = vpop.xlane.xlu0 %942 }
0x1343   :  { %v946_v12 = vpop.xlane.xlu1 %945 }
0x134b   :  { %v949_v9 = vpop.xlane.xlu2 %948 }
0x1353   :  { %v952_v13 = vpop.xlane.xlu2 %951 }
0x135b   :  { %v955_v18 = vpop.xlane.xlu0 %954 }
0x135c   :  { %v965_v24 = vmax.f32 %v943_v10, %v955_v18 }
0x1363   :  { %v958_v20 = vpop.xlane.xlu1 %957 }
0x1364   :  { %v966_v63 = vmax.f32 %v946_v12, %v958_v20 }
0x1366   :  { %v969_v27 = vmax.f32 %v965_v24, %v966_v63 }
0x136b   :  { %v961_v21 = vpop.xlane.xlu2 %960 }
0x136c   :  { %v967_v25 = vmax.f32 %v949_v9, %v961_v21 }
0x1373   :  { %v964_v22 = vpop.xlane.xlu0 %963 }
0x1374   :  { %v968_v26 = vmax.f32 %v952_v13, %v964_v22 }
0x1376   :  { %v970_v28 = vmax.f32 %v967_v25, %v968_v26 }
0x1378   :  { %v971_v29 = vmax.f32 %v969_v27, %v970_v28 }
0x137a   :  { %v972_v30 = vsub.f32 %v943_v10, %v971_v29  ;;  %v973_v5 = vsub.f32 %v946_v12, %v971_v29  ;;  %v974_v50 = vsub.f32 %v949_v9, %v971_v29  ;;  %v975_v31 = vsub.f32 %v952_v13, %v971_v29 }
0x137b   :  { %v976_v32 = vsub.f32 %v955_v18, %v971_v29  ;;  %v977_v34 = vsub.f32 %v958_v20, %v971_v29  ;;  %v978_v23 = vsub.f32 %v961_v21, %v971_v29  ;;  %v979_v14 = vsub.f32 %v964_v22, %v971_v29 }
0x137c   :  { %v980_v19 = vmul.f32 1.442695, %v972_v30  ;;  %v982_v6 = vmul.f32 1.442695, %v973_v5  ;;  %v984_v33 = vmul.f32 1.442695, %v974_v50 }
0x137d   :  { %v986_v46 = vmul.f32 1.442695, %v975_v31  ;;  %v988_v39 = vmul.f32 1.442695, %v976_v32  ;;  %v990_v40 = vmul.f32 1.442695, %v977_v34 }
0x137e   :  { %1255 = vpow2.f32 %v980_v19  ;;  %v992_v45 = vmul.f32 1.442695, %v978_v23  ;;  %v994_v53 = vmul.f32 1.442695, %v979_v14 }
0x137f   :  { %1257 = vpow2.f32 %v982_v6 }
0x1380   :  { %1259 = vpow2.f32 %v984_v33 }
0x1381   :  { %1261 = vpow2.f32 %v986_v46 }
0x1382   :  { %1263 = vpow2.f32 %v988_v39 }
0x1383   :  { %1265 = vpow2.f32 %v990_v40 }
0x1384   :  { %v1256_v16 = vpop.eup %1255  ;;  %1267 = vpow2.f32 %v992_v45 }
0x1385   :  { %v1258_v43 = vpop.eup %1257  ;;  %1269 = vpow2.f32 %v994_v53 }
0x1386   :  { %v996_v51 = vadd.f32 %v1258_v43, %v1256_v16  ;;  %v1260_v52 = vpop.eup %1259 }
0x1387   :  { %v1262_v59 = vpop.eup %1261 }
0x1388   :  { %v997_v58 = vadd.f32 %v1260_v52, %v996_v51  ;;  %v1264_v62 = vpop.eup %1263 }
0x1389   :  { %v1266_v1 = vpop.eup %1265 }
0x138a   :  { %v998_v61 = vadd.f32 %v1262_v59, %v997_v58  ;;  %v1268_v3 = vpop.eup %1267 }
0x138b   :  { %v1270_v11 = vpop.eup %1269 }
0x138c   :  { %v999_v0 = vadd.f32 %v1264_v62, %v998_v61 }
0x138e   :  { %v1000_v2 = vadd.f32 %v1266_v1, %v999_v0 }
0x1390   :  { %v1001_v4 = vadd.f32 %v1268_v3, %v1000_v2 }
0x1392   :  { %v1002_v17 = vadd.f32 %v1270_v11, %v1001_v4 }
0x1394   :  { %1271 = vrcp.f32 %v1002_v17  ;;  %v1014_v10 = vand.u32 2147483648, %v1002_v17  ;;  %v1012_v13 = vand.u32 2147483647, %v1002_v17  ;;  %vm1008_vm4 = vweird.f32 %v1002_v17 }
0x1396   :  { %v1015_v20 = vor.u32 1.1754944e-38, %v1014_v10  ;;  %vm1013_vm6 = vcmp.eq.f32.partialorder %v1012_v13, 8.507059e+37 }
0x139a   :  { %v1272_v15 = vpop.eup %1271 }
0x139b   :  { %v1004_v8 = vmul.f32 %v1272_v15, %v1002_v17  ;;  %vm1009_vm0 = vweird.f32 %v1272_v15 }
0x139c   :  { %vm1010_vm5 = vmor %vm1008_vm4, %vm1009_vm0 }
0x139d   :  { %v1005_v9 = vsub.f32 1.0, %v1004_v8 }
0x139f   :  { %v1006_v12 = vmul.f32 %v1272_v15, %v1005_v9 }
0x13a1   :  { %v1007_v18 = vadd.f32 %v1272_v15, %v1006_v12 }
0x13a3   :  { %v1011_v21 = vsel %vm1010_vm5, %v1272_v15, %v1007_v18 }
0x13a4   :  { %v1016_v63 = vsel %vm1013_vm6, %v1015_v20, %v1011_v21 }
0x13a5   :  { %v1017_v22 = vmul.f32 %v1256_v16, %v1016_v63  ;;  %v1018_v24 = vmul.f32 %v1258_v43, %v1016_v63  ;;  %v1019_v25 = vmul.f32 %v1260_v52, %v1016_v63  ;;  %v1020_v26 = vmul.f32 %v1262_v59, %v1016_v63 }
0x13a6   :  { %v1021_v28 = vmul.f32 %v1264_v62, %v1016_v63  ;;  %v1022_v50 = vmul.f32 %v1266_v1, %v1016_v63  ;;  %v1023_v32 = vmul.f32 %v1268_v3, %v1016_v63 }
0x13a7   :  { %v1049_v27 = vmul.f32 %v1017_v22, %v1704_v41  ;;  %v1026_v29 = vmul.f32 %v1018_v24, %v1688_v36  ;;  %v1050_v30 = vmul.f32 %v1018_v24, %v1706_v42  ;;  %v1051_v5 = vmul.f32 %v1019_v25, %v1715_v47 }
0x13a8   :  { %v1052_v31 = vmul.f32 %v1020_v26, %v1713_v44  ;;  %v1027_v33 = vmul.f32 %v1019_v25, %v1696_v38  ;;  %v1053_v41 = vmul.f32 %v1021_v28, %v1731_v55  ;;  %v1025_v36 = vmul.f32 %v1017_v22, %v1686_v35 }
0x13a9   :  { %v1057_v19 = vsel %vm284_vm3, %v1049_v27, 0.0  ;;  %v1058_v6 = vsel %vm284_vm3, %v1050_v30, 0.0  ;;  %v1060_v46 = vsel %vm284_vm3, %v1051_v5, 0.0  ;;  %v1034_v42 = vsel %vm284_vm3, %v1026_v29, 0.0 }
0x13aa   :  { %v1059_v34 = vadd.f32 %v1058_v6, %v1057_v19  ;;  %v1024_v47 = vmul.f32 %v1270_v11, %v1016_v63  ;;  %v1028_v44 = vmul.f32 %v1020_v26, %v1698_v37  ;;  %v1054_v39 = vmul.f32 %v1022_v50, %v1729_v54 }
0x13ab   :  { %v1062_v14 = vsel %vm284_vm3, %v1052_v31, 0.0  ;;  %v1033_v40 = vsel %vm284_vm3, %v1025_v36, 0.0  ;;  %v1029_v55 = vmul.f32 %v1021_v28, %v1717_v48  ;;  %v1055_v43 = vmul.f32 %v1023_v32, %v1745_v7 }
0x13ac   :  { %v1061_v23 = vadd.f32 %v1060_v46, %v1059_v34  ;;  %v1035_v16 = vadd.f32 %v1034_v42, %v1033_v40  ;;  %v1064_v35 = vsel %vm284_vm3, %v1053_v41, 0.0  ;;  %v1036_v45 = vsel %vm284_vm3, %v1027_v33, 0.0 }
0x13ad   :  { %v1030_v37 = vmul.f32 %v1022_v50, %v1719_v49  ;;  %v1056_v54 = vmul.f32 %v1024_v47, %v1743_v60  ;;  %v1066_v53 = vsel %vm284_vm3, %v1054_v39, 0.0  ;;  %v1038_v58 = vsel %vm284_vm3, %v1028_v44, 0.0 }
0x13ae   :  { %v1063_v38 = vadd.f32 %v1062_v14, %v1061_v23  ;;  %v1037_v52 = vadd.f32 %v1036_v45, %v1035_v16  ;;  %v1031_v48 = vmul.f32 %v1023_v32, %v1733_v56  ;;  %v1068_v7 = vsel %vm284_vm3, %v1055_v43, 0.0 }
0x13af   :  { %v1040_v62 = vsel %vm284_vm3, %v1029_v55, 0.0  ;;  %v1032_v2 = vmul.f32 %v1024_v47, %v1735_v57  ;;  %v1070_v49 = vsel %vm284_vm3, %v1056_v54, 0.0  ;;  %v1042_v60 = vsel %vm284_vm3, %v1030_v37, 0.0 }
0x13b0   :  { %v1065_v51 = vadd.f32 %v1064_v35, %v1063_v38  ;;  %v1039_v61 = vadd.f32 %v1038_v58, %v1037_v52  ;;  %v1044_v11 = vsel %vm284_vm3, %v1031_v48, 0.0 }
0x13b1   :  { %v1046_v56 = vsel %vm284_vm3, %v1032_v2, 0.0 }
0x13b2   :  { %v1067_v59 = vadd.f32 %v1066_v53, %v1065_v51  ;;  %v1041_v1 = vadd.f32 %v1040_v62, %v1039_v61 }
0x13b4   :  { %v1069_v0 = vadd.f32 %v1068_v7, %v1067_v59  ;;  %v1043_v4 = vadd.f32 %v1042_v60, %v1041_v1 }
0x13b6   :  { %v1071_v3 = vadd.f32 %v1070_v49, %v1069_v0  ;;  %v1045_v17 = vadd.f32 %v1044_v11, %v1043_v4 }
0x13b8   :  { %1073 = vrot.lane.b32.xlu1 %v1071_v3, %s1435_s7  ;;  %v1047_v15 = vadd.f32 %v1046_v56, %v1045_v17 }
0x13ba   :  { %1048 = vst.msk [vmem:[#allocation13] sm:$0xff] %vm284_vm3, %v1047_v15 }
0x142a   :  { %v1074_v57 = vpop.permute.xlu1 %1073 }
0x142b   :  { %1077 = vst.msk [vmem:[#allocation13] sm:$0xff] %vm1076_vm7, %v1074_v57 }
0x142c   :  { %1088 = dma.vmem_to_hbm [thread:$0]  %s1084_s18, 128, %s1086_s21, [#allocation6]  }
0x142d   :  { %1423 = dma.done.wait [#allocation6], 128  }
0x142e   :  { %1424 = vsyncadd [#allocation6], 4294967168 }
0x142f   :  { %1093 = vsyncpa [#allocation5], 1 }
0x1430   :  { %1094 = vsyncpa [#allocation8], 1 }
0x1431   :  { %1095 = vsyncpa [#allocation11], 1 }
0x1432   :  { %1096 = vsyncpa [#allocation6], 1 }

</bundles_post_ra>
